<compile_context>
chip_gen: v6e
topology: v6e:2x2x1
jax: 0.10.0
libtpu: 0.0.40
codegen_flags: <defaults>
</compile_context>

<pallas_src>
import functools
import math

import jax
import jax.numpy as jnp
from jax.experimental import pallas as pl
from jax.experimental.pallas import tpu as pltpu


# ----------------------------------------------------------------------------
# In-kernel helpers
# ----------------------------------------------------------------------------
def _split_heads(x, num_heads):
    # (n, E) -> (H, n, D); minor (lane) dim stays minor in the transpose.
    n, e = x.shape
    d = e // num_heads
    return jnp.swapaxes(x.reshape(n, num_heads, d), 0, 1)


def _attention(q, k, v, w_out_t, num_heads, scale):
    """q: (L, E); k, v: (S, E); w_out_t: (E, E) pre-transposed. Returns (L, E)."""
    L, E = q.shape
    D = E // num_heads

    qh = _split_heads(q * scale, num_heads)        # (H, L, D)
    kh = _split_heads(k, num_heads)                # (H, S, D)
    vh = _split_heads(v, num_heads)                # (H, S, D)

    # Head-batched scores + online-stable softmax.
    s = jnp.einsum("hld,hsd->hls", qh, kh, preferred_element_type=jnp.float32)
    s = s - jnp.max(s, axis=-1, keepdims=True)
    p = jnp.exp(s)
    p = p * pl.reciprocal(jnp.sum(p, axis=-1, keepdims=True), approx=True)

    o = jnp.einsum("hls,hsd->hld", p, vh, preferred_element_type=jnp.float32)  # (H, L, D)

    # Fold the head-concat into the output projection: sublane-sliced weight.
    out = jnp.zeros((L, E), jnp.float32)
    for h in range(num_heads):
        out = out + jnp.dot(o[h], w_out_t[h * D:(h + 1) * D, :],
                            preferred_element_type=jnp.float32)
    return out


# ----------------------------------------------------------------------------
# Fused kernel: per grid step = one batch element, full mult_attn forward.
# ----------------------------------------------------------------------------
def _fused_mult_attn_kernel(e1_ref, e2_ref, e3_ref,
                            w1_qkv_t_ref, wq23_t_ref, w2_kv_t_ref, w3_kv_t_ref,
                            w1_out_t_ref, w2_out_t_ref, w3_out_t_ref,
                            o_ref, *, num_heads):
    E = e1_ref.shape[-1]
    D = E // num_heads
    scale = 1.0 / math.sqrt(D)

    x1 = e1_ref[0].astype(jnp.float32)             # (L,  E)
    x2 = e2_ref[0].astype(jnp.float32)             # (S2, E)
    x3 = e3_ref[0].astype(jnp.float32)             # (S3, E)

    # ---- MHA1: self-attention on x1; one (L,E)x(E,3E) projection -----------
    qkv1 = jnp.dot(x1, w1_qkv_t_ref[...], preferred_element_type=jnp.float32)  # (L, 3E)
    a1 = _attention(qkv1[:, :E], qkv1[:, E:2 * E], qkv1[:, 2 * E:],
                    w1_out_t_ref[...], num_heads, scale)
    a1 = jnp.maximum(a1, 0.0)                      # ReLU after MuA_1

    # ---- Q projections for MHA2/3 from a1 (stacked into one matmul) --------
    q23 = jnp.dot(a1, wq23_t_ref[...], preferred_element_type=jnp.float32)     # (L, 2E)

    # ---- K/V projections for MHA2 / MHA3 (stacked [Wk;Wv]^T) ---------------
    kv2 = jnp.dot(x2, w2_kv_t_ref[...], preferred_element_type=jnp.float32)    # (S2, 2E)
    kv3 = jnp.dot(x3, w3_kv_t_ref[...], preferred_element_type=jnp.float32)    # (S3, 2E)

    a2 = _attention(q23[:, :E], kv2[:, :E], kv2[:, E:],
                    w2_out_t_ref[...], num_heads, scale)
    a3 = _attention(q23[:, E:], kv3[:, :E], kv3[:, E:],
                    w3_out_t_ref[...], num_heads, scale)

    # ---- seq-sum + concat + ReLU, single dense store ------------------------
    s1 = jnp.sum(a1, axis=0, keepdims=True)        # (1, E)
    s2 = jnp.sum(a2, axis=0, keepdims=True)
    s3 = jnp.sum(a3, axis=0, keepdims=True)
    out = jnp.maximum(jnp.concatenate([s1, s2, s3], axis=-1), 0.0)  # (1, 3E)
    o_ref[0] = out.astype(o_ref.dtype)


# ----------------------------------------------------------------------------
# Wrapper: weight prep (one-time layout plumbing) + fused forward.
# ----------------------------------------------------------------------------
def prepare_params(params):
    """Pre-transpose / stack torch-style MHA weights for the fused kernel."""
    E = params["w_out_1"].shape[0]
    w2, w3 = params["w_in_2"], params["w_in_3"]
    wq2, wk2, wv2 = w2[:E], w2[E:2 * E], w2[2 * E:]
    wq3, wk3, wv3 = w3[:E], w3[E:2 * E], w3[2 * E:]
    return {
        "w1_qkv_t": jnp.transpose(params["w_in_1"]),                 # (E, 3E)
        "wq23_t": jnp.concatenate([wq2.T, wq3.T], axis=1),           # (E, 2E)
        "w2_kv_t": jnp.concatenate([wk2.T, wv2.T], axis=1),          # (E, 2E)
        "w3_kv_t": jnp.concatenate([wk3.T, wv3.T], axis=1),          # (E, 2E)
        "w1_out_t": jnp.transpose(params["w_out_1"]),                # (E, E)
        "w2_out_t": jnp.transpose(params["w_out_2"]),
        "w3_out_t": jnp.transpose(params["w_out_3"]),
    }


def mult_attn_forward(emb_1, emb_2, emb_3, prepared, num_heads):
    """emb_i: (L, N, E) seq-first (PyTorch MultiheadAttention default).

    Returns (N, 3E)."""
    # Cheap layout glue to batch-first; everything else runs in one kernel.
    e1 = jnp.transpose(emb_1, (1, 0, 2))           # (N, L,  E)
    e2 = jnp.transpose(emb_2, (1, 0, 2))           # (N, S2, E)
    e3 = jnp.transpose(emb_3, (1, 0, 2))           # (N, S3, E)
    N, L, E = e1.shape
    S2, S3 = e2.shape[1], e3.shape[1]

    kernel = functools.partial(_fused_mult_attn_kernel, num_heads=num_heads)
    out = pl.pallas_call(
        kernel,
        out_shape=jax.ShapeDtypeStruct((N, 1, 3 * E), jnp.float32),
        grid=(N,),
        in_specs=[
            pl.BlockSpec((1, L, E), lambda b: (b, 0, 0)),
            pl.BlockSpec((1, S2, E), lambda b: (b, 0, 0)),
            pl.BlockSpec((1, S3, E), lambda b: (b, 0, 0)),
            pl.BlockSpec((E, 3 * E), lambda b: (0, 0)),
            pl.BlockSpec((E, 2 * E), lambda b: (0, 0)),
            pl.BlockSpec((E, 2 * E), lambda b: (0, 0)),
            pl.BlockSpec((E, 2 * E), lambda b: (0, 0)),
            pl.BlockSpec((E, E), lambda b: (0, 0)),
            pl.BlockSpec((E, E), lambda b: (0, 0)),
            pl.BlockSpec((E, E), lambda b: (0, 0)),
        ],
        out_specs=pl.BlockSpec((1, 1, 3 * E), lambda b: (b, 0, 0)),
        compiler_params=pltpu.CompilerParams(dimension_semantics=("parallel",)),
    )(e1, e2, e3,
      prepared["w1_qkv_t"], prepared["wq23_t"], prepared["w2_kv_t"],
      prepared["w3_kv_t"], prepared["w1_out_t"], prepared["w2_out_t"],
      prepared["w3_out_t"])
    return out[:, 0, :]                            # (N, 3E)


# ----------------------------------------------------------------------------
# Pure-JAX reference (for correctness check).
# ----------------------------------------------------------------------------
def _mha_ref(q, k, v, w_in, w_out, num_heads):
    E = q.shape[-1]
    D = E // num_heads
    wq, wk, wv = w_in[:E], w_in[E:2 * E], w_in[2 * E:]
    Q, K, V = q @ wq.T, k @ wk.T, v @ wv.T
    N, L, _ = Q.shape
    S = K.shape[1]
    Qh = Q.reshape(N, L, num_heads, D).transpose(0, 2, 1, 3)
    Kh = K.reshape(N, S, num_heads, D).transpose(0, 2, 1, 3)
    Vh = V.reshape(N, S, num_heads, D).transpose(0, 2, 1, 3)
    s = jnp.einsum("nhld,nhsd->nhls", Qh, Kh) / math.sqrt(D)
    p = jax.nn.softmax(s, axis=-1)
    o = jnp.einsum("nhls,nhsd->nhld", p, Vh)
    return o.transpose(0, 2, 1, 3).reshape(N, L, E) @ w_out.T


def mult_attn_ref(emb_1, emb_2, emb_3, params, num_heads):
    e1 = jnp.transpose(emb_1, (1, 0, 2))
    e2 = jnp.transpose(emb_2, (1, 0, 2))
    e3 = jnp.transpose(emb_3, (1, 0, 2))
    a1 = jax.nn.relu(_mha_ref(e1, e1, e1, params["w_in_1"], params["w_out_1"], num_heads))
    a2 = _mha_ref(a1, e2, e2, params["w_in_2"], params["w_out_2"], num_heads)
    a3 = _mha_ref(a1, e3, e3, params["w_in_3"], params["w_out_3"], num_heads)
    return jax.nn.relu(jnp.concatenate(
        [jnp.sum(a1, axis=1), jnp.sum(a2, axis=1), jnp.sum(a3, axis=1)], axis=1))


if __name__ == "__main__":
    # config: emb_size=32, head_nu=4, drop_rate ignored (inference).
    EMB = 32
    HEADS = 4
    L = 8   # sequence length
    N = 2   # batch

    key = jax.random.PRNGKey(0)
    keys = jax.random.split(key, 9)

    def init_w(k, shape):
        bound = 1.0 / math.sqrt(shape[-1])
        return jax.random.uniform(k, shape, jnp.float32, -bound, bound)

    params = {
        "w_in_1": init_w(keys[0], (3 * EMB, EMB)),
        "w_out_1": init_w(keys[1], (EMB, EMB)),
        "w_in_2": init_w(keys[2], (3 * EMB, EMB)),
        "w_out_2": init_w(keys[3], (EMB, EMB)),
        "w_in_3": init_w(keys[4], (3 * EMB, EMB)),
        "w_out_3": init_w(keys[5], (EMB, EMB)),
    }

    # Inputs in PyTorch seq-first layout (L, N, E).
    emb_1 = jax.random.normal(keys[6], (L, N, EMB), jnp.float32)
    emb_2 = jax.random.normal(keys[7], (L, N, EMB), jnp.float32)
    emb_3 = jax.random.normal(keys[8], (L, N, EMB), jnp.float32)

    prepared = prepare_params(params)          # one-time weight layout prep
    fwd = jax.jit(functools.partial(mult_attn_forward, num_heads=HEADS))

    out = fwd(emb_1, emb_2, emb_3, prepared)
    out = jax.block_until_ready(out)

    ref = mult_attn_ref(emb_1, emb_2, emb_3, params, HEADS)
    assert out.shape == (N, 3 * EMB), out.shape
    # Tolerance allows for the EUP approximate reciprocal in the softmax denom.
    assert jnp.allclose(out, ref, rtol=2e-3, atol=2e-3), "mismatch vs JAX reference"

    # TODO(synk): dropout inside MultiheadAttention is implemented as inference
    # mode (identity); training-mode stochastic dropout is not reproduced.
    print("KERNEL_OK")
</pallas_src>

<mosaic_0001>
module attributes {stable_mosaic.version = 11 : i64} {
  func.func @_fused_mult_attn_kernel(%arg0: i32, %arg1: memref<1x8x32xf32, #tpu.memory_space<vmem>>, %arg2: memref<1x8x32xf32, #tpu.memory_space<vmem>>, %arg3: memref<1x8x32xf32, #tpu.memory_space<vmem>>, %arg4: memref<32x96xf32, #tpu.memory_space<vmem>>, %arg5: memref<32x64xf32, #tpu.memory_space<vmem>>, %arg6: memref<32x64xf32, #tpu.memory_space<vmem>>, %arg7: memref<32x64xf32, #tpu.memory_space<vmem>>, %arg8: memref<32x32xf32, #tpu.memory_space<vmem>>, %arg9: memref<32x32xf32, #tpu.memory_space<vmem>>, %arg10: memref<32x32xf32, #tpu.memory_space<vmem>>, %arg11: memref<1x1x96xf32, #tpu.memory_space<vmem>>) attributes {dimension_semantics = [#tpu.dimension_semantics<parallel>], iteration_bounds = array<i64: 2>, scalar_prefetch = 0 : i64, scratch_operands = 0 : i64, tpu.core_type = #tpu.core_type<tc>, window_params = [{transform_indices = @transform_0, window_bounds = array<i64: 1, 8, 32>}, {transform_indices = @transform_1, window_bounds = array<i64: 1, 8, 32>}, {transform_indices = @transform_2, window_bounds = array<i64: 1, 8, 32>}, {pipeline_mode = #tpu.pipeline_mode<synchronous>, transform_indices = @transform_3, window_bounds = array<i64: 32, 96>}, {pipeline_mode = #tpu.pipeline_mode<synchronous>, transform_indices = @transform_4, window_bounds = array<i64: 32, 64>}, {pipeline_mode = #tpu.pipeline_mode<synchronous>, transform_indices = @transform_5, window_bounds = array<i64: 32, 64>}, {pipeline_mode = #tpu.pipeline_mode<synchronous>, transform_indices = @transform_6, window_bounds = array<i64: 32, 64>}, {pipeline_mode = #tpu.pipeline_mode<synchronous>, transform_indices = @transform_7, window_bounds = array<i64: 32, 32>}, {pipeline_mode = #tpu.pipeline_mode<synchronous>, transform_indices = @transform_8, window_bounds = array<i64: 32, 32>}, {pipeline_mode = #tpu.pipeline_mode<synchronous>, transform_indices = @transform_9, window_bounds = array<i64: 32, 32>}, {transform_indices = @transform_10, window_bounds = array<i64: 1, 1, 96>}]} {
    %c0 = arith.constant 0 : index
    %c0_0 = arith.constant 0 : index
    %c0_1 = arith.constant 0 : index
    %0 = vector.load %arg1[%c0, %c0_0, %c0_1] : memref<1x8x32xf32, #tpu.memory_space<vmem>>, vector<1x8x32xf32>
    %1 = vector.shape_cast %0 : vector<1x8x32xf32> to vector<8x32xf32>
    %c0_2 = arith.constant 0 : index
    %c0_3 = arith.constant 0 : index
    %c0_4 = arith.constant 0 : index
    %2 = vector.load %arg2[%c0_2, %c0_3, %c0_4] : memref<1x8x32xf32, #tpu.memory_space<vmem>>, vector<1x8x32xf32>
    %3 = vector.shape_cast %2 : vector<1x8x32xf32> to vector<8x32xf32>
    %c0_5 = arith.constant 0 : index
    %c0_6 = arith.constant 0 : index
    %c0_7 = arith.constant 0 : index
    %4 = vector.load %arg3[%c0_5, %c0_6, %c0_7] : memref<1x8x32xf32, #tpu.memory_space<vmem>>, vector<1x8x32xf32>
    %5 = vector.shape_cast %4 : vector<1x8x32xf32> to vector<8x32xf32>
    %c0_8 = arith.constant 0 : index
    %c0_9 = arith.constant 0 : index
    %6 = vector.load %arg4[%c0_8, %c0_9] : memref<32x96xf32, #tpu.memory_space<vmem>>, vector<32x96xf32>
    %cst = arith.constant dense<0.000000e+00> : vector<8x96xf32>
    %7 = tpu.matmul %1, %6, %cst {dimension_numbers = #tpu.dot_dimension_numbers<[1], [0], [0], [1], [0, 0, 1, 1], [], []>} : vector<8x32xf32>, vector<32x96xf32>, vector<8x96xf32> -> vector<8x96xf32>
    %8 = vector.extract_strided_slice %7 {offsets = [0, 0], sizes = [8, 32], strides = [1, 1]} : vector<8x96xf32> to vector<8x32xf32>
    %9 = vector.extract_strided_slice %7 {offsets = [0, 32], sizes = [8, 32], strides = [1, 1]} : vector<8x96xf32> to vector<8x32xf32>
    %10 = vector.extract_strided_slice %7 {offsets = [0, 64], sizes = [8, 32], strides = [1, 1]} : vector<8x96xf32> to vector<8x32xf32>
    %c0_10 = arith.constant 0 : index
    %c0_11 = arith.constant 0 : index
    %11 = vector.load %arg8[%c0_10, %c0_11] : memref<32x32xf32, #tpu.memory_space<vmem>>, vector<32x32xf32>
    %cst_12 = arith.constant 0.353553385 : f32
    %12 = vector.broadcast %cst_12 : f32 to vector<8x32xf32>
    %13 = arith.mulf %8, %12 : vector<8x32xf32>
    %14 = vector.shape_cast %13 : vector<8x32xf32> to vector<8x4x8xf32>
    %15 = tpu.transpose %14, [1, 0, 2] : vector<8x4x8xf32> -> vector<4x8x8xf32>
    %16 = vector.shape_cast %9 : vector<8x32xf32> to vector<8x4x8xf32>
    %17 = tpu.transpose %16, [1, 0, 2] : vector<8x4x8xf32> -> vector<4x8x8xf32>
    %18 = vector.shape_cast %10 : vector<8x32xf32> to vector<8x4x8xf32>
    %19 = tpu.transpose %18, [1, 0, 2] : vector<8x4x8xf32> -> vector<4x8x8xf32>
    "tpu.trace_start"() <{level = 10 : i32, message = "hld,hsd->hls"}> : () -> ()
    %cst_13 = arith.constant dense<0.000000e+00> : vector<4x8x8xf32>
    %20 = tpu.matmul %15, %17, %cst_13 {dimension_numbers = #tpu.dot_dimension_numbers<[2], [2], [1], [1], [0, 0, 0, 1, 1, 1], [0], [0]>} : vector<4x8x8xf32>, vector<4x8x8xf32>, vector<4x8x8xf32> -> vector<4x8x8xf32>
    "tpu.trace_stop"() : () -> ()
    %cst_14 = arith.constant dense<0xFF800000> : vector<4x8xf32>
    %21 = vector.multi_reduction <maximumf>, %20, %cst_14 [2] : vector<4x8x8xf32> to vector<4x8xf32>
    %22 = vector.shape_cast %21 : vector<4x8xf32> to vector<4x8x1xf32>
    %23 = vector.broadcast %22 : vector<4x8x1xf32> to vector<4x8x8xf32>
    %24 = arith.subf %20, %23 : vector<4x8x8xf32>
    %25 = math.exp %24 : vector<4x8x8xf32>
    %cst_15 = arith.constant dense<0.000000e+00> : vector<4x8xf32>
    %26 = vector.multi_reduction <add>, %25, %cst_15 [2] : vector<4x8x8xf32> to vector<4x8xf32>
    %27 = vector.shape_cast %26 : vector<4x8xf32> to vector<4x8x1xf32>
    %28 = tpu.reciprocal %27 {approx = true} : vector<4x8x1xf32> -> vector<4x8x1xf32>
    %29 = vector.broadcast %28 : vector<4x8x1xf32> to vector<4x8x8xf32>
    %30 = arith.mulf %25, %29 : vector<4x8x8xf32>
    "tpu.trace_start"() <{level = 10 : i32, message = "hls,hsd->hld"}> : () -> ()
    %cst_16 = arith.constant dense<0.000000e+00> : vector<4x8x8xf32>
    %31 = tpu.matmul %30, %19, %cst_16 {dimension_numbers = #tpu.dot_dimension_numbers<[2], [1], [1], [2], [0, 0, 0, 1, 1, 2], [0], [0]>} : vector<4x8x8xf32>, vector<4x8x8xf32>, vector<4x8x8xf32> -> vector<4x8x8xf32>
    %cst_17 = arith.constant 0.000000e+00 : f32
    "tpu.trace_stop"() : () -> ()
    %32 = vector.broadcast %cst_17 : f32 to vector<8x32xf32>
    %33 = vector.extract_strided_slice %31 {offsets = [0, 0, 0], sizes = [1, 8, 8], strides = [1, 1, 1]} : vector<4x8x8xf32> to vector<1x8x8xf32>
    %34 = vector.shape_cast %33 : vector<1x8x8xf32> to vector<8x8xf32>
    %35 = vector.extract_strided_slice %11 {offsets = [0, 0], sizes = [8, 32], strides = [1, 1]} : vector<32x32xf32> to vector<8x32xf32>
    %cst_18 = arith.constant dense<0.000000e+00> : vector<8x32xf32>
    %36 = tpu.matmul %34, %35, %cst_18 {dimension_numbers = #tpu.dot_dimension_numbers<[1], [0], [0], [1], [0, 0, 1, 1], [], []>} : vector<8x8xf32>, vector<8x32xf32>, vector<8x32xf32> -> vector<8x32xf32>
    %37 = arith.addf %32, %36 : vector<8x32xf32>
    %38 = vector.extract_strided_slice %31 {offsets = [1, 0, 0], sizes = [1, 8, 8], strides = [1, 1, 1]} : vector<4x8x8xf32> to vector<1x8x8xf32>
    %39 = vector.shape_cast %38 : vector<1x8x8xf32> to vector<8x8xf32>
    %40 = vector.extract_strided_slice %11 {offsets = [8, 0], sizes = [8, 32], strides = [1, 1]} : vector<32x32xf32> to vector<8x32xf32>
    %cst_19 = arith.constant dense<0.000000e+00> : vector<8x32xf32>
    %41 = tpu.matmul %39, %40, %cst_19 {dimension_numbers = #tpu.dot_dimension_numbers<[1], [0], [0], [1], [0, 0, 1, 1], [], []>} : vector<8x8xf32>, vector<8x32xf32>, vector<8x32xf32> -> vector<8x32xf32>
    %42 = arith.addf %37, %41 : vector<8x32xf32>
    %43 = vector.extract_strided_slice %31 {offsets = [2, 0, 0], sizes = [1, 8, 8], strides = [1, 1, 1]} : vector<4x8x8xf32> to vector<1x8x8xf32>
    %44 = vector.shape_cast %43 : vector<1x8x8xf32> to vector<8x8xf32>
    %45 = vector.extract_strided_slice %11 {offsets = [16, 0], sizes = [8, 32], strides = [1, 1]} : vector<32x32xf32> to vector<8x32xf32>
    %cst_20 = arith.constant dense<0.000000e+00> : vector<8x32xf32>
    %46 = tpu.matmul %44, %45, %cst_20 {dimension_numbers = #tpu.dot_dimension_numbers<[1], [0], [0], [1], [0, 0, 1, 1], [], []>} : vector<8x8xf32>, vector<8x32xf32>, vector<8x32xf32> -> vector<8x32xf32>
    %47 = arith.addf %42, %46 : vector<8x32xf32>
    %48 = vector.extract_strided_slice %31 {offsets = [3, 0, 0], sizes = [1, 8, 8], strides = [1, 1, 1]} : vector<4x8x8xf32> to vector<1x8x8xf32>
    %49 = vector.shape_cast %48 : vector<1x8x8xf32> to vector<8x8xf32>
    %50 = vector.extract_strided_slice %11 {offsets = [24, 0], sizes = [8, 32], strides = [1, 1]} : vector<32x32xf32> to vector<8x32xf32>
    %cst_21 = arith.constant dense<0.000000e+00> : vector<8x32xf32>
    %51 = tpu.matmul %49, %50, %cst_21 {dimension_numbers = #tpu.dot_dimension_numbers<[1], [0], [0], [1], [0, 0, 1, 1], [], []>} : vector<8x8xf32>, vector<8x32xf32>, vector<8x32xf32> -> vector<8x32xf32>
    %52 = arith.addf %47, %51 : vector<8x32xf32>
    %cst_22 = arith.constant 0.000000e+00 : f32
    %53 = vector.broadcast %cst_22 : f32 to vector<8x32xf32>
    %54 = arith.maximumf %52, %53 : vector<8x32xf32>
    %c0_23 = arith.constant 0 : index
    %c0_24 = arith.constant 0 : index
    %55 = vector.load %arg5[%c0_23, %c0_24] : memref<32x64xf32, #tpu.memory_space<vmem>>, vector<32x64xf32>
    %cst_25 = arith.constant dense<0.000000e+00> : vector<8x64xf32>
    %56 = tpu.matmul %54, %55, %cst_25 {dimension_numbers = #tpu.dot_dimension_numbers<[1], [0], [0], [1], [0, 0, 1, 1], [], []>} : vector<8x32xf32>, vector<32x64xf32>, vector<8x64xf32> -> vector<8x64xf32>
    %c0_26 = arith.constant 0 : index
    %c0_27 = arith.constant 0 : index
    %57 = vector.load %arg6[%c0_26, %c0_27] : memref<32x64xf32, #tpu.memory_space<vmem>>, vector<32x64xf32>
    %cst_28 = arith.constant dense<0.000000e+00> : vector<8x64xf32>
    %58 = tpu.matmul %3, %57, %cst_28 {dimension_numbers = #tpu.dot_dimension_numbers<[1], [0], [0], [1], [0, 0, 1, 1], [], []>} : vector<8x32xf32>, vector<32x64xf32>, vector<8x64xf32> -> vector<8x64xf32>
    %c0_29 = arith.constant 0 : index
    %c0_30 = arith.constant 0 : index
    %59 = vector.load %arg7[%c0_29, %c0_30] : memref<32x64xf32, #tpu.memory_space<vmem>>, vector<32x64xf32>
    %cst_31 = arith.constant dense<0.000000e+00> : vector<8x64xf32>
    %60 = tpu.matmul %5, %59, %cst_31 {dimension_numbers = #tpu.dot_dimension_numbers<[1], [0], [0], [1], [0, 0, 1, 1], [], []>} : vector<8x32xf32>, vector<32x64xf32>, vector<8x64xf32> -> vector<8x64xf32>
    %61 = vector.extract_strided_slice %56 {offsets = [0, 0], sizes = [8, 32], strides = [1, 1]} : vector<8x64xf32> to vector<8x32xf32>
    %62 = vector.extract_strided_slice %58 {offsets = [0, 0], sizes = [8, 32], strides = [1, 1]} : vector<8x64xf32> to vector<8x32xf32>
    %63 = vector.extract_strided_slice %58 {offsets = [0, 32], sizes = [8, 32], strides = [1, 1]} : vector<8x64xf32> to vector<8x32xf32>
    %c0_32 = arith.constant 0 : index
    %c0_33 = arith.constant 0 : index
    %64 = vector.load %arg9[%c0_32, %c0_33] : memref<32x32xf32, #tpu.memory_space<vmem>>, vector<32x32xf32>
    %cst_34 = arith.constant 0.353553385 : f32
    %65 = vector.broadcast %cst_34 : f32 to vector<8x32xf32>
    %66 = arith.mulf %61, %65 : vector<8x32xf32>
    %67 = vector.shape_cast %66 : vector<8x32xf32> to vector<8x4x8xf32>
    %68 = tpu.transpose %67, [1, 0, 2] : vector<8x4x8xf32> -> vector<4x8x8xf32>
    %69 = vector.shape_cast %62 : vector<8x32xf32> to vector<8x4x8xf32>
    %70 = tpu.transpose %69, [1, 0, 2] : vector<8x4x8xf32> -> vector<4x8x8xf32>
    %71 = vector.shape_cast %63 : vector<8x32xf32> to vector<8x4x8xf32>
    %72 = tpu.transpose %71, [1, 0, 2] : vector<8x4x8xf32> -> vector<4x8x8xf32>
    "tpu.trace_start"() <{level = 10 : i32, message = "hld,hsd->hls"}> : () -> ()
    %cst_35 = arith.constant dense<0.000000e+00> : vector<4x8x8xf32>
    %73 = tpu.matmul %68, %70, %cst_35 {dimension_numbers = #tpu.dot_dimension_numbers<[2], [2], [1], [1], [0, 0, 0, 1, 1, 1], [0], [0]>} : vector<4x8x8xf32>, vector<4x8x8xf32>, vector<4x8x8xf32> -> vector<4x8x8xf32>
    "tpu.trace_stop"() : () -> ()
    %cst_36 = arith.constant dense<0xFF800000> : vector<4x8xf32>
    %74 = vector.multi_reduction <maximumf>, %73, %cst_36 [2] : vector<4x8x8xf32> to vector<4x8xf32>
    %75 = vector.shape_cast %74 : vector<4x8xf32> to vector<4x8x1xf32>
    %76 = vector.broadcast %75 : vector<4x8x1xf32> to vector<4x8x8xf32>
    %77 = arith.subf %73, %76 : vector<4x8x8xf32>
    %78 = math.exp %77 : vector<4x8x8xf32>
    %cst_37 = arith.constant dense<0.000000e+00> : vector<4x8xf32>
    %79 = vector.multi_reduction <add>, %78, %cst_37 [2] : vector<4x8x8xf32> to vector<4x8xf32>
    %80 = vector.shape_cast %79 : vector<4x8xf32> to vector<4x8x1xf32>
    %81 = tpu.reciprocal %80 {approx = true} : vector<4x8x1xf32> -> vector<4x8x1xf32>
    %82 = vector.broadcast %81 : vector<4x8x1xf32> to vector<4x8x8xf32>
    %83 = arith.mulf %78, %82 : vector<4x8x8xf32>
    "tpu.trace_start"() <{level = 10 : i32, message = "hls,hsd->hld"}> : () -> ()
    %cst_38 = arith.constant dense<0.000000e+00> : vector<4x8x8xf32>
    %84 = tpu.matmul %83, %72, %cst_38 {dimension_numbers = #tpu.dot_dimension_numbers<[2], [1], [1], [2], [0, 0, 0, 1, 1, 2], [0], [0]>} : vector<4x8x8xf32>, vector<4x8x8xf32>, vector<4x8x8xf32> -> vector<4x8x8xf32>
    %cst_39 = arith.constant 0.000000e+00 : f32
    "tpu.trace_stop"() : () -> ()
    %85 = vector.broadcast %cst_39 : f32 to vector<8x32xf32>
    %86 = vector.extract_strided_slice %84 {offsets = [0, 0, 0], sizes = [1, 8, 8], strides = [1, 1, 1]} : vector<4x8x8xf32> to vector<1x8x8xf32>
    %87 = vector.shape_cast %86 : vector<1x8x8xf32> to vector<8x8xf32>
    %88 = vector.extract_strided_slice %64 {offsets = [0, 0], sizes = [8, 32], strides = [1, 1]} : vector<32x32xf32> to vector<8x32xf32>
    %cst_40 = arith.constant dense<0.000000e+00> : vector<8x32xf32>
    %89 = tpu.matmul %87, %88, %cst_40 {dimension_numbers = #tpu.dot_dimension_numbers<[1], [0], [0], [1], [0, 0, 1, 1], [], []>} : vector<8x8xf32>, vector<8x32xf32>, vector<8x32xf32> -> vector<8x32xf32>
    %90 = arith.addf %85, %89 : vector<8x32xf32>
    %91 = vector.extract_strided_slice %84 {offsets = [1, 0, 0], sizes = [1, 8, 8], strides = [1, 1, 1]} : vector<4x8x8xf32> to vector<1x8x8xf32>
    %92 = vector.shape_cast %91 : vector<1x8x8xf32> to vector<8x8xf32>
    %93 = vector.extract_strided_slice %64 {offsets = [8, 0], sizes = [8, 32], strides = [1, 1]} : vector<32x32xf32> to vector<8x32xf32>
    %cst_41 = arith.constant dense<0.000000e+00> : vector<8x32xf32>
    %94 = tpu.matmul %92, %93, %cst_41 {dimension_numbers = #tpu.dot_dimension_numbers<[1], [0], [0], [1], [0, 0, 1, 1], [], []>} : vector<8x8xf32>, vector<8x32xf32>, vector<8x32xf32> -> vector<8x32xf32>
    %95 = arith.addf %90, %94 : vector<8x32xf32>
    %96 = vector.extract_strided_slice %84 {offsets = [2, 0, 0], sizes = [1, 8, 8], strides = [1, 1, 1]} : vector<4x8x8xf32> to vector<1x8x8xf32>
    %97 = vector.shape_cast %96 : vector<1x8x8xf32> to vector<8x8xf32>
    %98 = vector.extract_strided_slice %64 {offsets = [16, 0], sizes = [8, 32], strides = [1, 1]} : vector<32x32xf32> to vector<8x32xf32>
    %cst_42 = arith.constant dense<0.000000e+00> : vector<8x32xf32>
    %99 = tpu.matmul %97, %98, %cst_42 {dimension_numbers = #tpu.dot_dimension_numbers<[1], [0], [0], [1], [0, 0, 1, 1], [], []>} : vector<8x8xf32>, vector<8x32xf32>, vector<8x32xf32> -> vector<8x32xf32>
    %100 = arith.addf %95, %99 : vector<8x32xf32>
    %101 = vector.extract_strided_slice %84 {offsets = [3, 0, 0], sizes = [1, 8, 8], strides = [1, 1, 1]} : vector<4x8x8xf32> to vector<1x8x8xf32>
    %102 = vector.shape_cast %101 : vector<1x8x8xf32> to vector<8x8xf32>
    %103 = vector.extract_strided_slice %64 {offsets = [24, 0], sizes = [8, 32], strides = [1, 1]} : vector<32x32xf32> to vector<8x32xf32>
    %cst_43 = arith.constant dense<0.000000e+00> : vector<8x32xf32>
    %104 = tpu.matmul %102, %103, %cst_43 {dimension_numbers = #tpu.dot_dimension_numbers<[1], [0], [0], [1], [0, 0, 1, 1], [], []>} : vector<8x8xf32>, vector<8x32xf32>, vector<8x32xf32> -> vector<8x32xf32>
    %105 = arith.addf %100, %104 : vector<8x32xf32>
    %106 = vector.extract_strided_slice %56 {offsets = [0, 32], sizes = [8, 32], strides = [1, 1]} : vector<8x64xf32> to vector<8x32xf32>
    %107 = vector.extract_strided_slice %60 {offsets = [0, 0], sizes = [8, 32], strides = [1, 1]} : vector<8x64xf32> to vector<8x32xf32>
    %108 = vector.extract_strided_slice %60 {offsets = [0, 32], sizes = [8, 32], strides = [1, 1]} : vector<8x64xf32> to vector<8x32xf32>
    %c0_44 = arith.constant 0 : index
    %c0_45 = arith.constant 0 : index
    %109 = vector.load %arg10[%c0_44, %c0_45] : memref<32x32xf32, #tpu.memory_space<vmem>>, vector<32x32xf32>
    %cst_46 = arith.constant 0.353553385 : f32
    %110 = vector.broadcast %cst_46 : f32 to vector<8x32xf32>
    %111 = arith.mulf %106, %110 : vector<8x32xf32>
    %112 = vector.shape_cast %111 : vector<8x32xf32> to vector<8x4x8xf32>
    %113 = tpu.transpose %112, [1, 0, 2] : vector<8x4x8xf32> -> vector<4x8x8xf32>
    %114 = vector.shape_cast %107 : vector<8x32xf32> to vector<8x4x8xf32>
    %115 = tpu.transpose %114, [1, 0, 2] : vector<8x4x8xf32> -> vector<4x8x8xf32>
    %116 = vector.shape_cast %108 : vector<8x32xf32> to vector<8x4x8xf32>
    %117 = tpu.transpose %116, [1, 0, 2] : vector<8x4x8xf32> -> vector<4x8x8xf32>
    "tpu.trace_start"() <{level = 10 : i32, message = "hld,hsd->hls"}> : () -> ()
    %cst_47 = arith.constant dense<0.000000e+00> : vector<4x8x8xf32>
    %118 = tpu.matmul %113, %115, %cst_47 {dimension_numbers = #tpu.dot_dimension_numbers<[2], [2], [1], [1], [0, 0, 0, 1, 1, 1], [0], [0]>} : vector<4x8x8xf32>, vector<4x8x8xf32>, vector<4x8x8xf32> -> vector<4x8x8xf32>
    "tpu.trace_stop"() : () -> ()
    %cst_48 = arith.constant dense<0xFF800000> : vector<4x8xf32>
    %119 = vector.multi_reduction <maximumf>, %118, %cst_48 [2] : vector<4x8x8xf32> to vector<4x8xf32>
    %120 = vector.shape_cast %119 : vector<4x8xf32> to vector<4x8x1xf32>
    %121 = vector.broadcast %120 : vector<4x8x1xf32> to vector<4x8x8xf32>
    %122 = arith.subf %118, %121 : vector<4x8x8xf32>
    %123 = math.exp %122 : vector<4x8x8xf32>
    %cst_49 = arith.constant dense<0.000000e+00> : vector<4x8xf32>
    %124 = vector.multi_reduction <add>, %123, %cst_49 [2] : vector<4x8x8xf32> to vector<4x8xf32>
    %125 = vector.shape_cast %124 : vector<4x8xf32> to vector<4x8x1xf32>
    %126 = tpu.reciprocal %125 {approx = true} : vector<4x8x1xf32> -> vector<4x8x1xf32>
    %127 = vector.broadcast %126 : vector<4x8x1xf32> to vector<4x8x8xf32>
    %128 = arith.mulf %123, %127 : vector<4x8x8xf32>
    "tpu.trace_start"() <{level = 10 : i32, message = "hls,hsd->hld"}> : () -> ()
    %cst_50 = arith.constant dense<0.000000e+00> : vector<4x8x8xf32>
    %129 = tpu.matmul %128, %117, %cst_50 {dimension_numbers = #tpu.dot_dimension_numbers<[2], [1], [1], [2], [0, 0, 0, 1, 1, 2], [0], [0]>} : vector<4x8x8xf32>, vector<4x8x8xf32>, vector<4x8x8xf32> -> vector<4x8x8xf32>
    %cst_51 = arith.constant 0.000000e+00 : f32
    "tpu.trace_stop"() : () -> ()
    %130 = vector.broadcast %cst_51 : f32 to vector<8x32xf32>
    %131 = vector.extract_strided_slice %129 {offsets = [0, 0, 0], sizes = [1, 8, 8], strides = [1, 1, 1]} : vector<4x8x8xf32> to vector<1x8x8xf32>
    %132 = vector.shape_cast %131 : vector<1x8x8xf32> to vector<8x8xf32>
    %133 = vector.extract_strided_slice %109 {offsets = [0, 0], sizes = [8, 32], strides = [1, 1]} : vector<32x32xf32> to vector<8x32xf32>
    %cst_52 = arith.constant dense<0.000000e+00> : vector<8x32xf32>
    %134 = tpu.matmul %132, %133, %cst_52 {dimension_numbers = #tpu.dot_dimension_numbers<[1], [0], [0], [1], [0, 0, 1, 1], [], []>} : vector<8x8xf32>, vector<8x32xf32>, vector<8x32xf32> -> vector<8x32xf32>
    %135 = arith.addf %130, %134 : vector<8x32xf32>
    %136 = vector.extract_strided_slice %129 {offsets = [1, 0, 0], sizes = [1, 8, 8], strides = [1, 1, 1]} : vector<4x8x8xf32> to vector<1x8x8xf32>
    %137 = vector.shape_cast %136 : vector<1x8x8xf32> to vector<8x8xf32>
    %138 = vector.extract_strided_slice %109 {offsets = [8, 0], sizes = [8, 32], strides = [1, 1]} : vector<32x32xf32> to vector<8x32xf32>
    %cst_53 = arith.constant dense<0.000000e+00> : vector<8x32xf32>
    %139 = tpu.matmul %137, %138, %cst_53 {dimension_numbers = #tpu.dot_dimension_numbers<[1], [0], [0], [1], [0, 0, 1, 1], [], []>} : vector<8x8xf32>, vector<8x32xf32>, vector<8x32xf32> -> vector<8x32xf32>
    %140 = arith.addf %135, %139 : vector<8x32xf32>
    %141 = vector.extract_strided_slice %129 {offsets = [2, 0, 0], sizes = [1, 8, 8], strides = [1, 1, 1]} : vector<4x8x8xf32> to vector<1x8x8xf32>
    %142 = vector.shape_cast %141 : vector<1x8x8xf32> to vector<8x8xf32>
    %143 = vector.extract_strided_slice %109 {offsets = [16, 0], sizes = [8, 32], strides = [1, 1]} : vector<32x32xf32> to vector<8x32xf32>
    %cst_54 = arith.constant dense<0.000000e+00> : vector<8x32xf32>
    %144 = tpu.matmul %142, %143, %cst_54 {dimension_numbers = #tpu.dot_dimension_numbers<[1], [0], [0], [1], [0, 0, 1, 1], [], []>} : vector<8x8xf32>, vector<8x32xf32>, vector<8x32xf32> -> vector<8x32xf32>
    %145 = arith.addf %140, %144 : vector<8x32xf32>
    %146 = vector.extract_strided_slice %129 {offsets = [3, 0, 0], sizes = [1, 8, 8], strides = [1, 1, 1]} : vector<4x8x8xf32> to vector<1x8x8xf32>
    %147 = vector.shape_cast %146 : vector<1x8x8xf32> to vector<8x8xf32>
    %148 = vector.extract_strided_slice %109 {offsets = [24, 0], sizes = [8, 32], strides = [1, 1]} : vector<32x32xf32> to vector<8x32xf32>
    %cst_55 = arith.constant dense<0.000000e+00> : vector<8x32xf32>
    %149 = tpu.matmul %147, %148, %cst_55 {dimension_numbers = #tpu.dot_dimension_numbers<[1], [0], [0], [1], [0, 0, 1, 1], [], []>} : vector<8x8xf32>, vector<8x32xf32>, vector<8x32xf32> -> vector<8x32xf32>
    %150 = arith.addf %145, %149 : vector<8x32xf32>
    %cst_56 = arith.constant dense<0.000000e+00> : vector<32xf32>
    %151 = vector.multi_reduction <add>, %54, %cst_56 [0] : vector<8x32xf32> to vector<32xf32>
    %152 = vector.shape_cast %151 : vector<32xf32> to vector<1x32xf32>
    %cst_57 = arith.constant dense<0.000000e+00> : vector<32xf32>
    %153 = vector.multi_reduction <add>, %105, %cst_57 [0] : vector<8x32xf32> to vector<32xf32>
    %154 = vector.shape_cast %153 : vector<32xf32> to vector<1x32xf32>
    %cst_58 = arith.constant dense<0.000000e+00> : vector<32xf32>
    %155 = vector.multi_reduction <add>, %150, %cst_58 [0] : vector<8x32xf32> to vector<32xf32>
    %156 = vector.shape_cast %155 : vector<32xf32> to vector<1x32xf32>
    %157 = tpu.concatenate %152, %154, %156 in 1 : vector<1x32xf32>, vector<1x32xf32>, vector<1x32xf32> -> vector<1x96xf32>
    %cst_59 = arith.constant 0.000000e+00 : f32
    %158 = vector.broadcast %cst_59 : f32 to vector<1x96xf32>
    %159 = arith.maximumf %157, %158 : vector<1x96xf32>
    %c0_60 = arith.constant 0 : index
    %c0_61 = arith.constant 0 : index
    %c0_62 = arith.constant 0 : index
    %160 = vector.load %arg11[%c0_60, %c0_61, %c0_62] : memref<1x1x96xf32, #tpu.memory_space<vmem>>, vector<1x1x96xf32>
    %161 = vector.shape_cast %160 : vector<1x1x96xf32> to vector<1x96xf32>
    %162 = vector.shape_cast %159 : vector<1x96xf32> to vector<1x1x96xf32>
    tpu.vector_store %arg11[%c0_60, %c0_61, %c0_62], %162 {strides = array<i32>} : memref<1x1x96xf32, #tpu.memory_space<vmem>>, vector<1x1x96xf32>,
    return
  }
  func.func @transform_0(%arg0: i32) -> (i32, i32, i32) {
    %c0_i32 = arith.constant 0 : i32
    %c0_i32_0 = arith.constant 0 : i32
    %c0_i32_1 = arith.constant 0 : i32
    return %arg0, %c0_i32, %c0_i32_0 : i32, i32, i32
  }
  func.func @transform_1(%arg0: i32) -> (i32, i32, i32) {
    %c0_i32 = arith.constant 0 : i32
    %c0_i32_0 = arith.constant 0 : i32
    %c0_i32_1 = arith.constant 0 : i32
    return %arg0, %c0_i32, %c0_i32_0 : i32, i32, i32
  }
  func.func @transform_2(%arg0: i32) -> (i32, i32, i32) {
    %c0_i32 = arith.constant 0 : i32
    %c0_i32_0 = arith.constant 0 : i32
    %c0_i32_1 = arith.constant 0 : i32
    return %arg0, %c0_i32, %c0_i32_0 : i32, i32, i32
  }
  func.func @transform_3(%arg0: i32) -> (i32, i32) {
    %c0_i32 = arith.constant 0 : i32
    %c0_i32_0 = arith.constant 0 : i32
    %c0_i32_1 = arith.constant 0 : i32
    return %c0_i32, %c0_i32_0 : i32, i32
  }
  func.func @transform_4(%arg0: i32) -> (i32, i32) {
    %c0_i32 = arith.constant 0 : i32
    %c0_i32_0 = arith.constant 0 : i32
    %c0_i32_1 = arith.constant 0 : i32
    return %c0_i32, %c0_i32_0 : i32, i32
  }
  func.func @transform_5(%arg0: i32) -> (i32, i32) {
    %c0_i32 = arith.constant 0 : i32
    %c0_i32_0 = arith.constant 0 : i32
    %c0_i32_1 = arith.constant 0 : i32
    return %c0_i32, %c0_i32_0 : i32, i32
  }
  func.func @transform_6(%arg0: i32) -> (i32, i32) {
    %c0_i32 = arith.constant 0 : i32
    %c0_i32_0 = arith.constant 0 : i32
    %c0_i32_1 = arith.constant 0 : i32
    return %c0_i32, %c0_i32_0 : i32, i32
  }
  func.func @transform_7(%arg0: i32) -> (i32, i32) {
    %c0_i32 = arith.constant 0 : i32
    %c0_i32_0 = arith.constant 0 : i32
    %c0_i32_1 = arith.constant 0 : i32
    return %c0_i32, %c0_i32_0 : i32, i32
  }
  func.func @transform_8(%arg0: i32) -> (i32, i32) {
    %c0_i32 = arith.constant 0 : i32
    %c0_i32_0 = arith.constant 0 : i32
    %c0_i32_1 = arith.constant 0 : i32
    return %c0_i32, %c0_i32_0 : i32, i32
  }
  func.func @transform_9(%arg0: i32) -> (i32, i32) {
    %c0_i32 = arith.constant 0 : i32
    %c0_i32_0 = arith.constant 0 : i32
    %c0_i32_1 = arith.constant 0 : i32
    return %c0_i32, %c0_i32_0 : i32, i32
  }
  func.func @transform_10(%arg0: i32) -> (i32, i32, i32) {
    %c0_i32 = arith.constant 0 : i32
    %c0_i32_0 = arith.constant 0 : i32
    %c0_i32_1 = arith.constant 0 : i32
    return %arg0, %c0_i32, %c0_i32_0 : i32, i32, i32
  }
}

</mosaic_0001>

<bundles_post_ra>
// kernel: mult_attn_forward.1
= control target key start
LH: loop header
LB: loop body
LE: loop exit
PB: predicated region body
PF: predicated region fallthrough
CT: control target
= control target key end

     0   :  { %15 = vsyncpa [#allocation3], 0  ;;  %s6621_s0 = inlined_call_operand.vmem [shape: f32[2,8,32], index: 0, kind: input, shape index: {}]   ;;  %s6622_s1 = inlined_call_operand.vmem [shape: f32[2,8,32], index: 1, kind: input, shape index: {}]   ;;  %s6623_s2 = inlined_call_operand.vmem [shape: f32[2,8,32], index: 2, kind: input, shape index: {}]   ;;  %s6624_s3 = inlined_call_operand.vmem [shape: f32[32,96], index: 3, kind: input, shape index: {}]   ;;  %s6625_s4 = inlined_call_operand.vmem [shape: f32[32,64], index: 4, kind: input, shape index: {}]   ;;  %s6626_s5 = inlined_call_operand.vmem [shape: f32[32,64], index: 5, kind: input, shape index: {}]   ;;  %s6627_s6 = inlined_call_operand.hbm [shape: f32[32,64], index: 6, kind: input, shape index: {}]   ;;  %s6628_s7 = inlined_call_operand.hbm [shape: f32[32,32], index: 7, kind: input, shape index: {}]   ;;  %s6629_s8 = inlined_call_operand.hbm [shape: f32[32,32], index: 8, kind: input, shape index: {}]   ;;  %s6630_s9 = inlined_call_operand.hbm [shape: f32[32,32], index: 9, kind: input, shape index: {}]   ;;  %s6631_s10 = inlined_call_operand.hbm [shape: f32[2,1,96], index: 10, kind: output, shape index: {}]  }
   0x1   :  { %16 = vsyncpa [#allocation6], 0 }
   0x2   :  { %17 = vsyncpa [#allocation9], 0 }
   0x3   :  { %18 = vsyncpa [#allocation4], 0 }
   0x4   :  { %20 = vsyncpa [#allocation4 + $0x1], 0  ;;  %s5870_s13 = smov 0   ;;  %s5872_s14 = smov 0  }
   0x5   :  { %s5874_s15 = smov 0   ;;  %s5876_s16 = smov 0  }
   0x6 LB: > { %s5891_s17 = sadd.s32 4294967295, %s5796_s16   ;;  %s5076_s18 = sadd.s32 4294967294, %s5796_s16   ;;  %s5796_s16 = sphi %s5876_s16, %s6643_s16   ;;  %s5792_s15 = sphi %s5874_s15, %s6642_s15   ;;  %s5788_s14 = sphi %s5872_s14, %s6641_s14   ;;  %s5784_s13 = sphi %s5870_s13, %s6640_s13  }
   0x7   : > { %s5895_s19 = sadd.s32 1, %s5796_s16   ;;  %s258_s20 = sadd.s32 1, %s5792_s15 }
   0x8   : > { %s255_s21 = ssub.s32 %s5796_s16, %s5895_s19  ;;  %p268_p0 = scmp.ne.s32.totalorder %s5792_s15, %s5788_s14 }
   0x9   : > { %p256_p1 = scmp.eq.s32.totalorder %s255_s21, 0  ;;  %p269_p2 = scmp.eq.s32.totalorder %s5891_s17, 1 }
   0xa   : > { %p274_p3 = scmp.ne.s32.totalorder %s5788_s14, %s5784_s13  ;;  %p275_p4 = scmp.eq.s32.totalorder %s5076_s18, 1 }
   0xb   : > { %s5906_s22 = scalar_select %p256_p1, %s5792_s15, %s258_s20  }
   0xc   : > { %p5908_p5 = por %p269_p2, %p268_p0  ;;  %p5912_p6 = por %p275_p4, %p274_p3 }
   0xd   : > { %6633 = sst [smem:[#allocation15_spill]] %s5906_s22  ;;  %p5077_p7 = scmp.ge.s32.totalorder %s5796_s16, 1 }
   0xe   : > { %p282_p8 = scmp.lt.s32.totalorder %s5796_s16, 3  ;;  %p5515_p9 = scmp.eq.s32.totalorder %s5891_s17, 0 }
   0xf   : > { %s5798_s26 = smov [#allocation5]   ;;  %s5799_s29 = smov [#allocation2]  }
  0x10   : > { %p5919_p10 = pnand %p5077_p7, %p282_p8  ;;  %s316_s27 = sshll.u32 %s5798_s26, 4  ;;  %s317_s27 = int_to_ptr.vmem [resolvable:$true] %s316_s27 }
  0x11   : > { %s303_s30 = sshll.u32 %s5799_s29, 4  ;;  %s5800_s11 = smov [#allocation7]   ;;  %s304_s30 = int_to_ptr.vmem [resolvable:$true] %s303_s30 }
  0x12   : > { %p5498_p11 = pneg %p5919_p10  ;;  %s329_s12 = sshll.u32 %s5800_s11, 4  ;;  %s330_s12 = int_to_ptr.vmem [resolvable:$true] %s329_s12 }
  0x13   : > { %s5631_s18 = scalar_lea.vmem %s317_s27, 512  ;;  %p5639_p3 = scmp.lt.s32.totalorder %s317_s27, %s317_s27 }
  0x14   : > { %p5927_p12 = pnand %p5515_p9, %p5498_p11  ;;  %p5632_p0 = scmp.ne.s32.totalorder %s317_s27, %s5631_s18 }
  0x15   : > { %p5640_p4 = scmp.lt.s32.totalorder %s5631_s18, %s5631_s18 }
  0x16   : > { %p5622_p13 = pneg %p5927_p12 }
  0x17   : > { %p5641_p7 = por %p5640_p4, %p5639_p3 }
  0x18   : > { %p5634_p1 = pnand %p5632_p0, %p5622_p13 }
  0x1a   : > { %p5635_p2 = pneg %p5634_p1 }
  0x1c   : > { %p5642_p8 = pnand %p5641_p7, %p5635_p2 }
  0x1e   : > { %5645 = shalt.err (!%p5642_p8)
}
  0x1f   : > { %s5801_s20 = smov 128   ;;  %s5802_s21 = smov 8  }
  0x20   : > { %5504 = dma.hbm_to_vmem [thread:$0]  (!%p5927_p12), %s6628_s7, 512, %s317_s27, [#allocation6], %s5801_s20, %s5801_s20, %s5802_s21  }
  0x21   : > { %s5657_s11 = scalar_lea.vmem %s304_s30, 512  ;;  %p5665_p2 = scmp.lt.s32.totalorder %s304_s30, %s304_s30 }
  0x22   : > { %p5658_p11 = scmp.ne.s32.totalorder %s304_s30, %s5657_s11  ;;  %p5666_p3 = scmp.lt.s32.totalorder %s5657_s11, %s5657_s11 }
  0x24   : > { %p5660_p0 = pnand %p5658_p11, %p5622_p13  ;;  %p5667_p4 = por %p5666_p3, %p5665_p2 }
  0x26   : > { %p5661_p1 = pneg %p5660_p0 }
  0x28   : > { %p5668_p7 = pnand %p5667_p4, %p5661_p1 }
  0x2a   : > { %5671 = shalt.err (!%p5668_p7)
}
  0x2b   : > { %5501 = dma.hbm_to_vmem [thread:$0]  (!%p5927_p12), %s6627_s6, 512, %s304_s30, [#allocation3], %s5801_s20, %s5801_s20, %s5802_s21  }
  0x2c   : > { %s5683_s27 = scalar_lea.vmem %s330_s12, 512  ;;  %p5691_p2 = scmp.lt.s32.totalorder %s330_s12, %s330_s12 }
  0x2d   : > { %p5684_p8 = scmp.ne.s32.totalorder %s330_s12, %s5683_s27  ;;  %p5692_p1 = scmp.lt.s32.totalorder %s5683_s27, %s5683_s27 }
  0x2f   : > { %p5686_p11 = pnand %p5684_p8, %p5622_p13  ;;  %p5693_p3 = por %p5692_p1, %p5691_p2 }
  0x31   : > { %p5687_p0 = pneg %p5686_p11 }
  0x33   : > { %p5694_p4 = pnand %p5693_p3, %p5687_p0 }
  0x35   : > { %5697 = shalt.err (!%p5694_p4)
}
  0x36   : > { %5507 = dma.hbm_to_vmem [thread:$0]  (!%p5927_p12), %s6629_s8, 512, %s330_s12, [#allocation6], %s5801_s20, %s5801_s20, %s5802_s21  }
  0x37   : > { %s5803_s30 = smov [#allocation8]  }
  0x38   : > { %s342_s29 = sshll.u32 %s5803_s30, 4  ;;  %s343_s29 = int_to_ptr.vmem [resolvable:$true] %s342_s29 }
  0x39   : > { %s5709_s11 = scalar_lea.vmem %s343_s29, 512  ;;  %p5717_p0 = scmp.lt.s32.totalorder %s343_s29, %s343_s29 }
  0x3a   : > { %p5710_p7 = scmp.ne.s32.totalorder %s343_s29, %s5709_s11  ;;  %p5718_p2 = scmp.lt.s32.totalorder %s5709_s11, %s5709_s11 }
  0x3c   : > { %p5712_p8 = pnand %p5710_p7, %p5622_p13  ;;  %p5719_p1 = por %p5718_p2, %p5717_p0 }
  0x3e   : > { %p5713_p11 = pneg %p5712_p8 }
  0x40   : > { %p5720_p3 = pnand %p5719_p1, %p5713_p11 }
  0x42   : > { %5723 = shalt.err (!%p5720_p3)
}
  0x43   : > { %5510 = dma.hbm_to_vmem [thread:$0]  (!%p5927_p12), %s6630_s9, 512, %s343_s29, [#allocation9], %s5801_s20, %s5801_s20, %s5802_s21  }
  0x44   : > { %379 = sbr.rel (%p5919_p10) target bundleno = 3564 (0xdec), region = 60 }
  0x49   : > { %5767 = dma.done.wait (%p5515_p9), [#allocation3], 512  }
  0x4a   : > { %5769 = vsyncadd (%p5515_p9), [#allocation3], 4294966784 }
  0x4b   : > { %5771 = dma.done.wait (%p5515_p9), [#allocation6], 1024  }
  0x4c   : > { %5773 = vsyncadd (%p5515_p9), [#allocation6], 4294966272 }
  0x4d   : > { %5775 = dma.done.wait (%p5515_p9), [#allocation9], 512  }
  0x4e   : > { %5777 = vsyncadd (%p5515_p9), [#allocation9], 4294966784  ;;  %p435_p10 = scmp.lt.s32.totalorder %s5891_s17, 1  ;;  %v5804_v0 = vmov 0.0   ;;  %vm5805_vm0 = vmmov 0   ;;  %v453_v1 = vld [vmem:[%s6624_s3 + $0x18] sm:$0xff]  ;;  %v548_v15 = vlaneseq }
  0x4f   : > { %5256 = vmatprep.subr.mxu0 %v5804_v0  ;;  %5264 = vmatprep.mubr.msk.f32.mxu0 %vm5805_vm0, %v5804_v0  ;;  %v452_v2 = vld [vmem:[%s6624_s3 + $0x10] sm:$0xff]  ;;  %v451_v3 = vld [vmem:[%s6624_s3 + $0x8] sm:$0xff]  ;;  %v450_v4 = vld [vmem:[%s6624_s3] sm:$0xff]  ;;  %vm454_vm1 = vcmask 261120   ;;  %s5806_s20 = smov 104   ;;  %s5807_s21 = smov 120  }
  0x50   : > { %s436_s25 = scalar_select %p435_p10, %s5891_s17, 1  ;;  %5267 = vmatprep.subr.mxu1 %v5804_v0  ;;  %5269 = vmatprep.mubr.msk.f32.mxu1 %vm5805_vm0, %v5804_v0  ;;  %v5810_v13 = vmov 1983009808   ;;  %v5811_v16 = vmov 1934713408   ;;  %v549_v19 = vshrl.u32 %v548_v15, 7 }
  0x51   : > { %5257 = vmatpush3.msra.mxu0 %v453_v1  ;;  %s5808_s27 = smov 96   ;;  %s5809_s22 = smov 112   ;;  %v546_v14 = vunpack.c.l.s4 %v5810_v13  ;;  %v578_v17 = vunpack.c.l.s4 %v5811_v16  ;;  %vm982_vm2 = vcmask 64512   ;;  %vm4938_vm3 = vcmask 523264  }
  0x52   : > { %s5999_s28 = sshll.u32 %s436_s25, 3  ;;  %5258 = vmatprep.subr.mxu0 %v5804_v0  ;;  %s6632_s26 = smov 64   ;;  %vm4941_vm4 = vcmask 778240  }
  0x53   : > { %s438_s12 = scalar_lea.vmem %s6621_s0, %s5999_s28  ;;  %5259 = vmatpush3.msra.mxu0 %v452_v2  ;;  %v547_v18 = vunpack.c.0.s8 %v546_v14  ;;  %v579_v22 = vunpack.c.0.s8 %v578_v17  ;;  %s446_s29 = scalar_lea.vmem %s6623_s2, %s5999_s28 }
  0x54   : > { %5260 = vmatprep.subr.mxu0 %v5804_v0  ;;  %v447_v5 = vld [vmem:[%s438_s12] sm:$0xff] }
  0x55   : > { %5261 = vmatpush3.msra.mxu0 %v451_v3  ;;  %v6050_v23 = vsub.s32 %v547_v18, %v549_v19  ;;  %v6052_v30 = vsub.s32 %v579_v22, %v549_v19 }
  0x56   : > { %5262 = vmatprep.subr.mxu0 %v5804_v0 }
  0x57   : > { %5263 = vmatpush3.msra.mxu0 %v450_v4 }
  0x58   : > { %5265 = vmatmul.mubr.msk.f32.vlgmr.msra.gmra.mxu0 %vm454_vm1, %v447_v5  ;;  %5277 = vmatprep.subr.mxu0 %v5804_v0 }
  0x59   : > { %5279 = vmatprep.mubr.msk.f32.mxu0 %vm5805_vm0, %v5804_v0 }
 0x118   : > { %v6024_v6 = vpop.f32.mrf.mxu0 }
 0x119   : > { %684 = vrot.lane.b32.xlu1 %v6024_v6, %s5806_s20  ;;  %680 = vrot.lane.b32.xlu0 %v6024_v6, %s5807_s21  ;;  %v532_v8 = vmul.f32 0.35355338, %v6024_v6 }
 0x11a   : > { %v5266_v7 = vpop.f32.mrf.mxu0 }
 0x11d   : > { %686 = vrot.lane.b32.xlu1 %v6024_v6, %s5808_s27  ;;  %682 = vrot.lane.b32.xlu0 %v6024_v6, %s5809_s22 }
 0x121   : > { %534 = vrot.lane.b32.xlu1 %v532_v8, %s5807_s21 }
 0x18b   : > { %v6036_v9 = vpop.permute.xlu0 %680  ;;  %v6040_v10 = vpop.permute.xlu1 %684 }
 0x18c   : > { %688 = vrot.lane.b32.xlu0 %v6036_v9, %s5808_s27 }
 0x18f   : > { %v6042_v11 = vpop.permute.xlu0 %682  ;;  %v687_v12 = vpop.permute.xlu1 %686 }
 0x190   : > { %692 = vrot.lane.b32.xlu0 %v6040_v10, %s5808_s27  ;;  %690 = vrot.lane.b32.xlu1 %v6042_v11, %s5808_s27 }
 0x193   : > { %v535_v20 = vpop.permute.xlu1 %534 }
 0x194   : > { %537 = vrot.lane.b32.xlu0 %v532_v8, %s5809_s22  ;;  %540 = vrot.lane.b32.xlu1 %v532_v8, %s5806_s20 }
 0x1fe   : > { %v689_v21 = vpop.permute.xlu0 %688 }
 0x202   : > { %v693_v24 = vpop.permute.xlu0 %692  ;;  %v691_v25 = vpop.permute.xlu1 %690 }
 0x203   : > { %v714_v26 = vcombine.low %v689_v21, %v693_v24  ;;  %v715_v27 = vcombine.high %v689_v21, %v693_v24  ;;  %v698_v28 = vcombine.low %v687_v12, %v691_v25  ;;  %v699_v29 = vcombine.high %v687_v12, %v691_v25 }
 0x205   : > { %v722_v31 = vrot.slane %v714_v26, %v6050_v23  ;;  %v729_v32 = vrot.slane %v715_v27, %v6050_v23  ;;  %v706_v33 = vrot.slane %v698_v28, %v6050_v23  ;;  %v713_v34 = vrot.slane %v699_v29, %v6050_v23 }
 0x206   : > { %v538_v35 = vpop.permute.xlu0 %537  ;;  %v541_v36 = vpop.permute.xlu1 %540 }
 0x207   : > { %v730_v37 = vcombine.low %v706_v33, %v722_v31  ;;  %v731_v38 = vcombine.high %v706_v33, %v722_v31  ;;  %v746_v39 = vcombine.low %v713_v34, %v729_v32  ;;  %v747_v40 = vcombine.high %v713_v34, %v729_v32 }
 0x208   : > { %v543_v41 = vcombine.low %v532_v8, %v538_v35  ;;  %v544_v42 = vcombine.high %v532_v8, %v538_v35  ;;  %v559_v43 = vcombine.low %v535_v20, %v541_v36  ;;  %v560_v44 = vcombine.high %v535_v20, %v541_v36 }
 0x209   : > { %v738_v45 = vrot.slane %v730_v37, %v6052_v30  ;;  %v745_v46 = vrot.slane %v731_v38, %v6052_v30  ;;  %v754_v47 = vrot.slane %v746_v39, %v6052_v30  ;;  %v761_v48 = vrot.slane %v747_v40, %v6052_v30 }
 0x20a   : > { %v551_v49 = vrot.slane %v543_v41, %v6050_v23  ;;  %v558_v50 = vrot.slane %v544_v42, %v6050_v23  ;;  %v567_v51 = vrot.slane %v559_v43, %v6050_v23  ;;  %v574_v52 = vrot.slane %v560_v44, %v6050_v23 }
 0x20b   : > { %v766_v53 = vcombine.low %v738_v45, %v745_v46  ;;  %v5094_v54 = vcombine.high %v738_v45, %v745_v46  ;;  %v782_v55 = vcombine.low %v754_v47, %v761_v48  ;;  %v5095_v56 = vcombine.high %v754_v47, %v761_v48 }
 0x20c   : > { %v575_v57 = vcombine.low %v551_v49, %v567_v51  ;;  %v576_v58 = vcombine.high %v551_v49, %v567_v51  ;;  %v591_v59 = vcombine.low %v558_v50, %v574_v52  ;;  %v592_v60 = vcombine.high %v558_v50, %v574_v52 }
 0x20d   : > { %v773_v61 = vrot.slane %v766_v53, %v6050_v23  ;;  %v781_v62 = vrot.slane %v5094_v54, %v6050_v23  ;;  %v789_v63 = vrot.slane %v782_v55, %v6050_v23  ;;  %v797_v1 = vrot.slane %v5095_v56, %v6050_v23 }
 0x20e   : > { %v583_v2 = vrot.slane %v575_v57, %v6052_v30  ;;  %v590_v3 = vrot.slane %v576_v58, %v6052_v30  ;;  %v599_v4 = vrot.slane %v591_v59, %v6052_v30  ;;  %v606_v5 = vrot.slane %v592_v60, %v6052_v30 }
 0x20f   : > { %v798_v7 = vcombine.low %v773_v61, %v781_v62  ;;  %v799_v8 = vcombine.high %v773_v61, %v781_v62  ;;  %v814_v12 = vcombine.low %v789_v63, %v797_v1  ;;  %v815_v13 = vcombine.high %v789_v63, %v797_v1 }
 0x210   : > { %v611_v14 = vcombine.low %v583_v2, %v590_v3  ;;  %v5092_v15 = vcombine.high %v583_v2, %v590_v3  ;;  %v627_v16 = vcombine.low %v599_v4, %v606_v5  ;;  %v5093_v17 = vcombine.high %v599_v4, %v606_v5 }
 0x211   : > { %v806_v18 = vrot.slane %v798_v7, %v6052_v30  ;;  %v822_v19 = vrot.slane %v814_v12, %v6052_v30  ;;  %v813_v20 = vrot.slane %v799_v8, %v6052_v30  ;;  %v829_v21 = vrot.slane %v815_v13, %v6052_v30 }
 0x212   : > { %v618_v22 = vrot.slane %v611_v14, %v6050_v23  ;;  %v626_v24 = vrot.slane %v5092_v15, %v6050_v23  ;;  %v634_v25 = vrot.slane %v627_v16, %v6050_v23  ;;  %v642_v26 = vrot.slane %v5093_v17, %v6050_v23 }
 0x213   : > { %v830_v27 = vcombine.low %v806_v18, %v822_v19  ;;  %v832_v28 = vcombine.low %v813_v20, %v829_v21  ;;  %v831_v40 = vcombine.high %v806_v18, %v822_v19  ;;  %v833_v42 = vcombine.high %v813_v20, %v829_v21 }
 0x214   : > { %v644_v29 = vcombine.high %v618_v22, %v626_v24  ;;  %v660_v31 = vcombine.high %v634_v25, %v642_v26  ;;  %v643_v32 = vcombine.low %v618_v22, %v626_v24  ;;  %v659_v33 = vcombine.low %v634_v25, %v642_v26 }
 0x215   : > { %5268 = vmatpush3.xpose.msk.msra.mxu1 %vm982_vm2, %v830_v27  ;;  %5278 = vmatpush3.xpose.msk.msra.mxu0 %vm982_vm2, %v832_v28 }
 0x216   : > { %5272 = vmatprep.subr.mxu1 %v5804_v0  ;;  %v651_v34 = vrot.slane %v643_v32, %v6052_v30  ;;  %v667_v35 = vrot.slane %v659_v33, %v6052_v30  ;;  %v658_v36 = vrot.slane %v644_v29, %v6052_v30  ;;  %v674_v37 = vrot.slane %v660_v31, %v6052_v30 }
 0x217   : > { %5287 = vmatprep.subr.mxu0 %v5804_v0 }
 0x218   : > { %v675_v38 = vcombine.low %v651_v34, %v667_v35  ;;  %v677_v39 = vcombine.low %v658_v36, %v674_v37  ;;  %v676_v41 = vcombine.high %v651_v34, %v667_v35  ;;  %v678_v43 = vcombine.high %v658_v36, %v674_v37 }
 0x21a   : > { %5270 = vmatmul.mubr.msk.f32.vlgmr.msra.gmra.mxu1 %vm982_vm2, %v675_v38  ;;  %5280 = vmatmul.mubr.msk.f32.vlgmr.msra.gmra.mxu0 %vm982_vm2, %v677_v39 }
 0x21b   : > { %5273 = vmatpush3.xpose.msk.msra.mxu1 %vm982_vm2, %v831_v40  ;;  %5274 = vmatprep.mubr.msk.f32.mxu1 %vm5805_vm0, %v5804_v0 }
 0x21c   : > { %5282 = vmatprep.subr.mxu1 %v5804_v0  ;;  %5289 = vmatprep.mubr.msk.f32.mxu0 %vm5805_vm0, %v5804_v0 }
 0x21e   : > { %5275 = vmatmul.mubr.msk.f32.vlgmr.msra.gmra.mxu1 %vm982_vm2, %v676_v41 }
 0x21f   : > { %5283 = vmatpush3.xpose.msk.msra.mxu1 %vm982_vm2, %v833_v42  ;;  %5284 = vmatprep.mubr.msk.f32.mxu1 %vm5805_vm0, %v5804_v0 }
 0x220   : > { %5292 = vmatprep.subr.mxu1 %v5804_v0 }
 0x222   : > { %5285 = vmatmul.mubr.msk.f32.vlgmr.msra.gmra.mxu1 %vm982_vm2, %v678_v43 }
 0x223   : > { %5294 = vmatprep.mubr.msk.f32.mxu1 %vm5805_vm0, %v5804_v0 }
 0x2da   : > { %v1055_v44 = vpop.f32.mrf.mxu1  ;;  %v1207_v45 = vpop.f32.mrf.mxu0 }
 0x2db   : > { %v1287_v46 = vsel %vm982_vm2, %v1055_v44, -inf  ;;  %v1293_v51 = vsel %vm982_vm2, %v1207_v45, -inf }
 0x2dc   : > { %1288 = vmax.xlane.f32.xlu0 %v1287_v46  ;;  %v5271_v47 = vpop.f32.mrf.mxu1  ;;  %v5281_v48 = vpop.f32.mrf.mxu0 }
 0x2de   : > { %v1131_v49 = vpop.f32.mrf.mxu1 }
 0x2df   : > { %v1290_v50 = vsel %vm982_vm2, %v1131_v49, -inf }
 0x2e0   : > { %1291 = vmax.xlane.f32.xlu1 %v1290_v50  ;;  %v5276_v52 = vpop.f32.mrf.mxu1  ;;  %1294 = vmax.xlane.f32.xlu0 %v1293_v51 }
 0x2e2   : > { %v1283_v53 = vpop.f32.mrf.mxu1 }
 0x2e3   : > { %v1296_v54 = vsel %vm982_vm2, %v1283_v53, -inf }
 0x2e4   : > { %v5286_v55 = vpop.f32.mrf.mxu1  ;;  %1297 = vmax.xlane.f32.xlu0 %v1296_v54 }
 0x2f1   : > { %834 = vrot.lane.b32.xlu1 %v6024_v6, %s6632_s26 }
 0x365   : > { %v1289_v56 = vpop.xlane.xlu0 %1288 }
 0x366   : > { %v1299_v57 = vsub.f32 %v1055_v44, %v1289_v56 }
 0x368   : > { %v1303_v58 = vmul.f32 1.442695, %v1299_v57 }
 0x369   : > { %v1292_v59 = vpop.xlane.xlu1 %1291  ;;  %v1295_v60 = vpop.xlane.xlu0 %1294 }
 0x36a   : > { %5572 = vpow2.f32 %v1303_v58  ;;  %v1300_v61 = vsub.f32 %v1131_v49, %v1292_v59  ;;  %v1301_v62 = vsub.f32 %v1207_v45, %v1295_v60 }
 0x36c   : > { %v1305_v63 = vmul.f32 1.442695, %v1300_v61  ;;  %v1307_v1 = vmul.f32 1.442695, %v1301_v62 }
 0x36d   : > { %v1298_v2 = vpop.xlane.xlu0 %1297  ;;  %v835_v16 = vpop.permute.xlu1 %834 }
 0x36e   : > { %5574 = vpow2.f32 %v1305_v63  ;;  %v1302_v3 = vsub.f32 %v1283_v53, %v1298_v2 }
 0x36f   : > { %5576 = vpow2.f32 %v1307_v1 }
 0x370   : > { %v1309_v4 = vmul.f32 1.442695, %v1302_v3 }
 0x372   : > { %5578 = vpow2.f32 %v1309_v4  ;;  %v529_v4 = vld [vmem:[#allocation5 + $0x8] sm:$0xff] }
 0x377   : > { %v6112_v5 = vpop.eup %5572 }
 0x378   : > { %v1311_v6 = vsel %vm982_vm2, %v6112_v5, 0.0 }
 0x379   : > { %1312 = vadd.xlane.f32.xlu1 %v1311_v6  ;;  %v530_v6 = vld [vmem:[#allocation5 + $0x10] sm:$0xff] }
 0x37b   : > { %v5575_v7 = vpop.eup %5574 }
 0x37c   : > { %v6116_v8 = vpop.eup %5576  ;;  %v1314_v12 = vsel %vm982_vm2, %v5575_v7, 0.0 }
 0x37d   : > { %1315 = vadd.xlane.f32.xlu0 %v1314_v12  ;;  %v1317_v13 = vsel %vm982_vm2, %v6116_v8, 0.0  ;;  %v531_v12 = vld [vmem:[#allocation5 + $0x18] sm:$0xff] }
 0x37e   : > { %1318 = vadd.xlane.f32.xlu1 %v1317_v13 }
 0x37f   : > { %v6121_v14 = vpop.eup %5578 }
 0x380   : > { %v1320_v15 = vsel %vm982_vm2, %v6121_v14, 0.0 }
 0x381   : > { %1321 = vadd.xlane.f32.xlu0 %v1320_v15  ;;  %v1998_v15 = vld [vmem:[%s6626_s5 + $0x18] sm:$0xff] }
 0x38f   : > { %838 = vrot.lane.b32.xlu1 %v6042_v11, %s6632_s26 }
 0x393   : > { %840 = vrot.lane.b32.xlu1 %v6040_v10, %s6632_s26 }
 0x397   : > { %836 = vrot.lane.b32.xlu0 %v6036_v9, %s6632_s26  ;;  %s442_s26 = scalar_lea.vmem %s6622_s1, %s5999_s28  ;;  %s5813_s28 = smov 32  }
 0x402   : > { %v1313_v17 = vpop.xlane.xlu1 %1312 }
 0x403   : > { %5580 = vrcp.f32 %v1313_v17 }
 0x406   : > { %v1316_v18 = vpop.xlane.xlu0 %1315 }
 0x407   : > { %v1319_v19 = vpop.xlane.xlu1 %1318  ;;  %5582 = vrcp.f32 %v1316_v18  ;;  %v1997_v18 = vld [vmem:[%s6626_s5 + $0x10] sm:$0xff] }
 0x408   : > { %5584 = vrcp.f32 %v1319_v19 }
 0x40a   : > { %v1322_v20 = vpop.xlane.xlu0 %1321 }
 0x40b   : > { %v839_v21 = vpop.permute.xlu1 %838  ;;  %5586 = vrcp.f32 %v1322_v20 }
 0x40c   : > { %v846_v22 = vcombine.low %v835_v16, %v839_v21  ;;  %v847_v24 = vcombine.high %v835_v16, %v839_v21  ;;  %v1996_v21 = vld [vmem:[%s6626_s5 + $0x8] sm:$0xff] }
 0x40e   : > { %v837_v25 = vpop.permute.xlu0 %836  ;;  %v854_v11 = vrot.slane %v846_v22, %v6050_v23  ;;  %v861_v10 = vrot.slane %v847_v24, %v6050_v23  ;;  %v1995_v22 = vld [vmem:[%s6626_s5] sm:$0xff] }
 0x40f   : > { %v841_v26 = vpop.permute.xlu1 %840  ;;  %v448_v24 = vld [vmem:[%s442_s26] sm:$0xff] }
 0x410   : > { %v862_v27 = vcombine.low %v837_v25, %v841_v26  ;;  %v863_v28 = vcombine.high %v837_v25, %v841_v26  ;;  %v5581_v51 = vpop.eup %5580  ;;  %v1921_v25 = vld [vmem:[%s6625_s4 + $0x18] sm:$0xff]  ;;  %v1920_v26 = vld [vmem:[%s6625_s4 + $0x10] sm:$0xff] }
 0x411   : > { %v1327_v60 = vmul.f32 %v5581_v51, %v6112_v5  ;;  %v528_v5 = vld [vmem:[#allocation5] sm:$0xff] }
 0x412   : > { %v870_v9 = vrot.slane %v862_v27, %v6050_v23  ;;  %v877_v29 = vrot.slane %v863_v28, %v6050_v23  ;;  %v1919_v27 = vld [vmem:[%s6625_s4 + $0x8] sm:$0xff]  ;;  %v1918_v28 = vld [vmem:[%s6625_s4] sm:$0xff] }
 0x414   : > { %v878_v31 = vcombine.low %v854_v11, %v870_v9  ;;  %v879_v32 = vcombine.high %v854_v11, %v870_v9  ;;  %v894_v33 = vcombine.low %v861_v10, %v877_v29  ;;  %v895_v34 = vcombine.high %v861_v10, %v877_v29  ;;  %v5583_v52 = vpop.eup %5582 }
 0x415   : > { %v5585_v57 = vpop.eup %5584  ;;  %v1328_v61 = vmul.f32 %v5583_v52, %v5575_v7 }
 0x416   : > { %v886_v35 = vrot.slane %v878_v31, %v6052_v30  ;;  %v893_v36 = vrot.slane %v879_v32, %v6052_v30  ;;  %v902_v37 = vrot.slane %v894_v33, %v6052_v30  ;;  %v909_v38 = vrot.slane %v895_v34, %v6052_v30 }
 0x417   : > { %v1329_v2 = vmul.f32 %v5585_v57, %v6116_v8 }
 0x418   : > { %v914_v39 = vcombine.low %v886_v35, %v893_v36  ;;  %v5096_v40 = vcombine.high %v886_v35, %v893_v36  ;;  %v930_v41 = vcombine.low %v902_v37, %v909_v38  ;;  %v5097_v42 = vcombine.high %v902_v37, %v909_v38  ;;  %v5587_v62 = vpop.eup %5586 }
 0x419   : > { %v1330_v3 = vmul.f32 %v5587_v62, %v6121_v14 }
 0x41a   : > { %v921_v43 = vrot.slane %v914_v39, %v6050_v23  ;;  %v929_v44 = vrot.slane %v5096_v40, %v6050_v23  ;;  %v937_v45 = vrot.slane %v930_v41, %v6050_v23  ;;  %v945_v46 = vrot.slane %v5097_v42, %v6050_v23  ;;  %v2075_v41 = vld [vmem:[#allocation2 + $0x18] sm:$0xff]  ;;  %v2074_v42 = vld [vmem:[#allocation2 + $0x10] sm:$0xff] }
 0x41c   : > { %v946_v47 = vcombine.low %v921_v43, %v929_v44  ;;  %v962_v48 = vcombine.low %v937_v45, %v945_v46  ;;  %v947_v49 = vcombine.high %v921_v43, %v929_v44  ;;  %v963_v50 = vcombine.high %v937_v45, %v945_v46  ;;  %v2073_v43 = vld [vmem:[#allocation2 + $0x8] sm:$0xff]  ;;  %v2072_v44 = vld [vmem:[#allocation2] sm:$0xff] }
 0x41d   : > { %v449_v45 = vld [vmem:[%s446_s29] sm:$0xff] }
 0x41e   : > { %v954_v53 = vrot.slane %v946_v47, %v6052_v30  ;;  %v970_v54 = vrot.slane %v962_v48, %v6052_v30  ;;  %v961_v55 = vrot.slane %v947_v49, %v6052_v30  ;;  %v977_v56 = vrot.slane %v963_v50, %v6052_v30 }
 0x420   : > { %v978_v58 = vcombine.low %v954_v53, %v970_v54  ;;  %v979_v59 = vcombine.high %v954_v53, %v970_v54  ;;  %v980_v63 = vcombine.low %v961_v55, %v977_v56  ;;  %v981_v1 = vcombine.high %v961_v55, %v977_v56 }
 0x422   : > { %5288 = vmatpush3.msra.mxu0 %v978_v58  ;;  %5293 = vmatpush3.msra.mxu1 %v979_v59 }
 0x423   : > { %5290 = vmatmul.mubr.msk.f32.vlgmr.msra.gmra.mxu0 %vm982_vm2, %v1327_v60  ;;  %5295 = vmatmul.mubr.msk.f32.vlgmr.msra.gmra.mxu1 %vm982_vm2, %v1328_v61 }
 0x424   : > { %5297 = vmatprep.subr.mxu0 %v5804_v0  ;;  %5302 = vmatprep.subr.mxu1 %v5804_v0 }
 0x425   : > { %5298 = vmatpush3.msra.mxu0 %v980_v63  ;;  %5303 = vmatpush3.msra.mxu1 %v981_v1 }
 0x426   : > { %5299 = vmatprep.mubr.msk.f32.mxu0 %vm5805_vm0, %v5804_v0  ;;  %5304 = vmatprep.mubr.msk.f32.mxu1 %vm5805_vm0, %v5804_v0 }
 0x427   : > { %5300 = vmatmul.mubr.msk.f32.vlgmr.msra.gmra.mxu0 %vm982_vm2, %v1329_v2  ;;  %5305 = vmatmul.mubr.msk.f32.vlgmr.msra.gmra.mxu1 %vm982_vm2, %v1330_v3 }
 0x428   : > { %5307 = vmatprep.subr.mxu0 %v5804_v0  ;;  %5312 = vmatprep.subr.mxu1 %v5804_v0 }
 0x429   : > { %5309 = vmatprep.mubr.msk.f32.mxu0 %vm5805_vm0, %v5804_v0  ;;  %5314 = vmatprep.mubr.msk.f32.mxu1 %vm5805_vm0, %v5804_v0 }
 0x42a   : > { %5308 = vmatpush3.msra.mxu0 %v529_v4  ;;  %5313 = vmatpush3.msra.mxu1 %v528_v5 }
 0x42b   : > { %5317 = vmatprep.subr.mxu0 %v5804_v0  ;;  %5322 = vmatprep.subr.mxu1 %v5804_v0 }
 0x4e3   : > { %v1400_v7 = vpop.f32.mrf.mxu0  ;;  %v1473_v8 = vpop.f32.mrf.mxu1 }
 0x4e4   : > { %5310 = vmatmul.mubr.msk.f32.vlgmr.msra.gmra.mxu0 %vm982_vm2, %v1473_v8  ;;  %5315 = vmatmul.mubr.msk.f32.vlgmr.msra.gmra.mxu1 %vm982_vm2, %v1400_v7 }
 0x4e5   : > { %v5291_v13 = vpop.f32.mrf.mxu0  ;;  %v5296_v14 = vpop.f32.mrf.mxu1  ;;  %5318 = vmatpush3.msra.mxu0 %v530_v6  ;;  %5319 = vmatprep.mubr.msk.f32.mxu0 %vm5805_vm0, %v5804_v0 }
 0x4e6   : > { %5323 = vmatpush3.msra.mxu1 %v531_v12  ;;  %5324 = vmatprep.mubr.msk.f32.mxu1 %vm5805_vm0, %v5804_v0 }
 0x4e7   : > { %v1546_v16 = vpop.f32.mrf.mxu0  ;;  %v1619_v17 = vpop.f32.mrf.mxu1  ;;  %5338 = vmatprep.subr.mxu1 %v5804_v0  ;;  %5327 = vmatprep.subr.mxu0 %v5804_v0 }
 0x4e8   : > { %5320 = vmatmul.mubr.msk.f32.vlgmr.msra.gmra.mxu0 %vm982_vm2, %v1546_v16  ;;  %5325 = vmatmul.mubr.msk.f32.vlgmr.msra.gmra.mxu1 %vm982_vm2, %v1619_v17 }
 0x4e9   : > { %v5301_v19 = vpop.f32.mrf.mxu0  ;;  %v5306_v20 = vpop.f32.mrf.mxu1  ;;  %5339 = vmatpush3.msra.mxu1 %v1998_v15  ;;  %5346 = vmatprep.mubr.msk.f32.mxu1 %vm5805_vm0, %v5804_v0 }
 0x4ea   : > { %5340 = vmatprep.subr.mxu1 %v5804_v0  ;;  %5335 = vmatprep.mubr.msk.f32.mxu0 %vm5805_vm0, %v5804_v0 }
 0x4eb   : > { %5341 = vmatpush3.msra.mxu1 %v1997_v18  ;;  %5328 = vmatpush3.msra.mxu0 %v1921_v25 }
 0x4ec   : > { %5342 = vmatprep.subr.mxu1 %v5804_v0  ;;  %5329 = vmatprep.subr.mxu0 %v5804_v0 }
 0x4ed   : > { %5343 = vmatpush3.msra.mxu1 %v1996_v21  ;;  %5330 = vmatpush3.msra.mxu0 %v1920_v26 }
 0x4ee   : > { %5344 = vmatprep.subr.mxu1 %v5804_v0  ;;  %5331 = vmatprep.subr.mxu0 %v5804_v0 }
 0x4ef   : > { %5345 = vmatpush3.msra.mxu1 %v1995_v22  ;;  %5332 = vmatpush3.msra.mxu0 %v1919_v27 }
 0x4f0   : > { %5347 = vmatmul.mubr.msk.f32.vlgmr.msra.gmra.mxu1 %vm454_vm1, %v448_v24  ;;  %5360 = vmatprep.subr.mxu1 %v5804_v0 }
 0x4f1   : > { %5362 = vmatprep.mubr.msk.f32.mxu1 %vm5805_vm0, %v5804_v0  ;;  %5333 = vmatprep.subr.mxu0 %v5804_v0 }
 0x4f2   : > { %5334 = vmatpush3.msra.mxu0 %v1918_v28 }
 0x4f3   : > { %5349 = vmatprep.subr.mxu0 %v5804_v0 }
 0x5a4   : > { %v1692_v11 = vpop.f32.mrf.mxu0  ;;  %v1765_v10 = vpop.f32.mrf.mxu1 }
 0x5a5   : > { %v1766_v31 = vadd.f32 %v1765_v10, %v1692_v11 }
 0x5a6   : > { %v5311_v9 = vpop.f32.mrf.mxu0  ;;  %v5316_v29 = vpop.f32.mrf.mxu1 }
 0x5a8   : > { %v1838_v32 = vpop.f32.mrf.mxu0  ;;  %v1912_v33 = vpop.f32.mrf.mxu1 }
 0x5a9   : > { %v1842_v34 = vadd.f32 %v1838_v32, %v1766_v31 }
 0x5aa   : > { %v5321_v35 = vpop.f32.mrf.mxu0  ;;  %v5326_v36 = vpop.f32.mrf.mxu1 }
 0x5ab   : > { %v6221_v37 = vadd.f32 %v1912_v33, %v1842_v34 }
 0x5ad   : > { %v1917_v38 = vmax.f32 %v6221_v37, 0.0 }
 0x5af   : > { %5336 = vmatmul.mubr.msk.f32.vlgmr.msra.gmra.mxu0 %vm454_vm1, %v1917_v38 }
 0x5b0   : > { %v6227_v39 = vpop.f32.mrf.mxu1  ;;  %5357 = vmatprep.mubr.msk.f32.mxu0 %vm5805_vm0, %v5804_v0  ;;  %5350 = vmatpush3.msra.mxu0 %v2075_v41 }
 0x5b1   : > { %2301 = vrot.lane.b32.xlu0 %v6227_v39, %s5807_s21  ;;  %2304 = vrot.lane.b32.xlu1 %v6227_v39, %s5809_s22 }
 0x5b2   : > { %v5348_v40 = vpop.f32.mrf.mxu1  ;;  %5351 = vmatprep.subr.mxu0 %v5804_v0 }
 0x5b3   : > { %5352 = vmatpush3.msra.mxu0 %v2074_v42 }
 0x5b4   : > { %5353 = vmatprep.subr.mxu0 %v5804_v0 }
 0x5b5   : > { %2307 = vrot.lane.b32.xlu0 %v6227_v39, %s5806_s20  ;;  %5354 = vmatpush3.msra.mxu0 %v2073_v43 }
 0x5b6   : > { %5355 = vmatprep.subr.mxu0 %v5804_v0 }
 0x5b7   : > { %5356 = vmatpush3.msra.mxu0 %v2072_v44 }
 0x5b8   : > { %5370 = vmatprep.subr.mxu0 %v5804_v0  ;;  %5358 = vmatmul.mubr.msk.f32.vlgmr.msra.gmra.mxu0 %vm454_vm1, %v449_v45 }
 0x5b9   : > { %5372 = vmatprep.mubr.msk.f32.mxu0 %vm5805_vm0, %v5804_v0 }
 0x623   : > { %v6248_v46 = vpop.permute.xlu0 %2301  ;;  %v6250_v47 = vpop.permute.xlu1 %2304 }
 0x624   : > { %v2310_v48 = vcombine.low %v6227_v39, %v6250_v47  ;;  %v2311_v49 = vcombine.high %v6227_v39, %v6250_v47 }
 0x626   : > { %v2318_v51 = vrot.slane %v2310_v48, %v6050_v23  ;;  %v2325_v52 = vrot.slane %v2311_v49, %v6050_v23 }
 0x627   : > { %v6256_v50 = vpop.permute.xlu0 %2307 }
 0x628   : > { %v2326_v53 = vcombine.low %v6248_v46, %v6256_v50  ;;  %v2327_v54 = vcombine.high %v6248_v46, %v6256_v50 }
 0x62a   : > { %v2334_v55 = vrot.slane %v2326_v53, %v6050_v23  ;;  %v2341_v56 = vrot.slane %v2327_v54, %v6050_v23 }
 0x62c   : > { %v2342_v57 = vcombine.low %v2318_v51, %v2334_v55  ;;  %v2343_v58 = vcombine.high %v2318_v51, %v2334_v55  ;;  %v2358_v59 = vcombine.low %v2325_v52, %v2341_v56  ;;  %v2359_v60 = vcombine.high %v2325_v52, %v2341_v56 }
 0x62e   : > { %v2350_v61 = vrot.slane %v2342_v57, %v6052_v30  ;;  %v2357_v62 = vrot.slane %v2343_v58, %v6052_v30  ;;  %v2366_v63 = vrot.slane %v2358_v59, %v6052_v30  ;;  %v2373_v1 = vrot.slane %v2359_v60, %v6052_v30 }
 0x630   : > { %v2378_v2 = vcombine.low %v2350_v61, %v2357_v62  ;;  %v5119_v3 = vcombine.high %v2350_v61, %v2357_v62  ;;  %v2394_v4 = vcombine.low %v2366_v63, %v2373_v1  ;;  %v5120_v5 = vcombine.high %v2366_v63, %v2373_v1 }
 0x632   : > { %v2385_v6 = vrot.slane %v2378_v2, %v6050_v23  ;;  %v2393_v7 = vrot.slane %v5119_v3, %v6050_v23  ;;  %v2401_v8 = vrot.slane %v2394_v4, %v6050_v23  ;;  %v2409_v12 = vrot.slane %v5120_v5, %v6050_v23 }
 0x634   : > { %v2410_v13 = vcombine.low %v2385_v6, %v2393_v7  ;;  %v2411_v14 = vcombine.high %v2385_v6, %v2393_v7  ;;  %v2426_v15 = vcombine.low %v2401_v8, %v2409_v12  ;;  %v2427_v16 = vcombine.high %v2401_v8, %v2409_v12 }
 0x636   : > { %v2418_v17 = vrot.slane %v2410_v13, %v6052_v30  ;;  %v2434_v18 = vrot.slane %v2426_v15, %v6052_v30  ;;  %v6277_v19 = vrot.slane %v2411_v14, %v6052_v30  ;;  %v6280_v20 = vrot.slane %v2427_v16, %v6052_v30 }
 0x638   : > { %v2442_v21 = vcombine.low %v2418_v17, %v2434_v18  ;;  %v2444_v22 = vcombine.low %v6277_v19, %v6280_v20  ;;  %v2443_v24 = vcombine.high %v2418_v17, %v2434_v18  ;;  %v2445_v25 = vcombine.high %v6277_v19, %v6280_v20 }
 0x63a   : > { %5361 = vmatpush3.xpose.msk.msra.mxu1 %vm982_vm2, %v2442_v21  ;;  %5371 = vmatpush3.xpose.msk.msra.mxu0 %vm982_vm2, %v2444_v22 }
 0x63b   : > { %5365 = vmatprep.subr.mxu1 %v5804_v0  ;;  %5380 = vmatprep.subr.mxu0 %v5804_v0 }
 0x66f   : > { %v1991_v26 = vpop.f32.mrf.mxu0 }
 0x670   : > { %v6290_v27 = vmul.f32 0.35355338, %v1991_v26 }
 0x671   : > { %v5337_v28 = vpop.f32.mrf.mxu0 }
 0x672   : > { %2158 = vrot.lane.b32.xlu0 %v6290_v27, %s5809_s22  ;;  %2155 = vrot.lane.b32.xlu1 %v6290_v27, %s5807_s21 }
 0x676   : > { %2161 = vrot.lane.b32.xlu1 %v6290_v27, %s5806_s20 }
 0x678   : > { %v6298_v11 = vpop.f32.mrf.mxu0 }
 0x67a   : > { %v5359_v10 = vpop.f32.mrf.mxu0 }
 0x6e4   : > { %v6300_v9 = vpop.permute.xlu0 %2158  ;;  %v6302_v29 = vpop.permute.xlu1 %2155 }
 0x6e5   : > { %v2164_v31 = vcombine.low %v6290_v27, %v6300_v9  ;;  %v2165_v32 = vcombine.high %v6290_v27, %v6300_v9 }
 0x6e7   : > { %v2172_v36 = vrot.slane %v2164_v31, %v6050_v23  ;;  %v2179_v40 = vrot.slane %v2165_v32, %v6050_v23 }
 0x6e8   : > { %v6308_v33 = vpop.permute.xlu1 %2161 }
 0x6e9   : > { %v2180_v34 = vcombine.low %v6302_v29, %v6308_v33  ;;  %v2181_v35 = vcombine.high %v6302_v29, %v6308_v33 }
 0x6eb   : > { %v2188_v41 = vrot.slane %v2180_v34, %v6050_v23  ;;  %v2195_v42 = vrot.slane %v2181_v35, %v6050_v23 }
 0x6ed   : > { %v2196_v43 = vcombine.low %v2172_v36, %v2188_v41  ;;  %v2197_v44 = vcombine.high %v2172_v36, %v2188_v41  ;;  %v2212_v45 = vcombine.low %v2179_v40, %v2195_v42  ;;  %v2213_v48 = vcombine.high %v2179_v40, %v2195_v42 }
 0x6ef   : > { %v2204_v49 = vrot.slane %v2196_v43, %v6052_v30  ;;  %v2211_v51 = vrot.slane %v2197_v44, %v6052_v30  ;;  %v2220_v52 = vrot.slane %v2212_v45, %v6052_v30  ;;  %v2227_v53 = vrot.slane %v2213_v48, %v6052_v30 }
 0x6f1   : > { %v2232_v54 = vcombine.low %v2204_v49, %v2211_v51  ;;  %v5117_v55 = vcombine.high %v2204_v49, %v2211_v51  ;;  %v2248_v56 = vcombine.low %v2220_v52, %v2227_v53  ;;  %v5118_v57 = vcombine.high %v2220_v52, %v2227_v53 }
 0x6f3   : > { %v2239_v58 = vrot.slane %v2232_v54, %v6050_v23  ;;  %v2247_v59 = vrot.slane %v5117_v55, %v6050_v23  ;;  %v2255_v60 = vrot.slane %v2248_v56, %v6050_v23  ;;  %v2263_v61 = vrot.slane %v5118_v57, %v6050_v23 }
 0x6f5   : > { %v2264_v62 = vcombine.low %v2239_v58, %v2247_v59  ;;  %v2265_v63 = vcombine.high %v2239_v58, %v2247_v59  ;;  %v2280_v1 = vcombine.low %v2255_v60, %v2263_v61  ;;  %v2281_v2 = vcombine.high %v2255_v60, %v2263_v61 }
 0x6f7   : > { %v2272_v3 = vrot.slane %v2264_v62, %v6052_v30  ;;  %v2288_v4 = vrot.slane %v2280_v1, %v6052_v30  ;;  %v2279_v5 = vrot.slane %v2265_v63, %v6052_v30  ;;  %v2295_v6 = vrot.slane %v2281_v2, %v6052_v30 }
 0x6f9   : > { %v2296_v7 = vcombine.low %v2272_v3, %v2288_v4  ;;  %v2298_v8 = vcombine.low %v2279_v5, %v2295_v6  ;;  %v2297_v12 = vcombine.high %v2272_v3, %v2288_v4  ;;  %v2299_v13 = vcombine.high %v2279_v5, %v2295_v6 }
 0x6fb   : > { %5363 = vmatmul.mubr.msk.f32.vlgmr.msra.gmra.mxu1 %vm982_vm2, %v2296_v7  ;;  %5373 = vmatmul.mubr.msk.f32.vlgmr.msra.gmra.mxu0 %vm982_vm2, %v2298_v8 }
 0x6fc   : > { %5366 = vmatpush3.xpose.msk.msra.mxu1 %vm982_vm2, %v2443_v24  ;;  %5367 = vmatprep.mubr.msk.f32.mxu1 %vm5805_vm0, %v5804_v0 }
 0x6fd   : > { %5375 = vmatprep.subr.mxu1 %v5804_v0  ;;  %5382 = vmatprep.mubr.msk.f32.mxu0 %vm5805_vm0, %v5804_v0 }
 0x6ff   : > { %5368 = vmatmul.mubr.msk.f32.vlgmr.msra.gmra.mxu1 %vm982_vm2, %v2297_v12 }
 0x700   : > { %5376 = vmatpush3.xpose.msk.msra.mxu1 %vm982_vm2, %v2445_v25  ;;  %5377 = vmatprep.mubr.msk.f32.mxu1 %vm5805_vm0, %v5804_v0 }
 0x701   : > { %5385 = vmatprep.subr.mxu1 %v5804_v0 }
 0x703   : > { %5378 = vmatmul.mubr.msk.f32.vlgmr.msra.gmra.mxu1 %vm982_vm2, %v2299_v13 }
 0x704   : > { %5387 = vmatprep.mubr.msk.f32.mxu1 %vm5805_vm0, %v5804_v0 }
 0x7bb   : > { %v2666_v14 = vpop.f32.mrf.mxu1  ;;  %v2818_v15 = vpop.f32.mrf.mxu0 }
 0x7bc   : > { %v2898_v16 = vsel %vm982_vm2, %v2666_v14, -inf  ;;  %v2904_v21 = vsel %vm982_vm2, %v2818_v15, -inf }
 0x7bd   : > { %2899 = vmax.xlane.f32.xlu0 %v2898_v16  ;;  %v5364_v17 = vpop.f32.mrf.mxu1  ;;  %v5374_v18 = vpop.f32.mrf.mxu0 }
 0x7bf   : > { %v2742_v19 = vpop.f32.mrf.mxu1 }
 0x7c0   : > { %v2901_v20 = vsel %vm982_vm2, %v2742_v19, -inf }
 0x7c1   : > { %2902 = vmax.xlane.f32.xlu1 %v2901_v20  ;;  %v5369_v22 = vpop.f32.mrf.mxu1  ;;  %2905 = vmax.xlane.f32.xlu0 %v2904_v21 }
 0x7c3   : > { %v2894_v24 = vpop.f32.mrf.mxu1 }
 0x7c4   : > { %v2907_v25 = vsel %vm982_vm2, %v2894_v24, -inf }
 0x7c5   : > { %v5379_v26 = vpop.f32.mrf.mxu1  ;;  %2908 = vmax.xlane.f32.xlu0 %v2907_v25 }
 0x7d2   : > { %2446 = vrot.lane.b32.xlu1 %v6227_v39, %s5808_s27 }
 0x846   : > { %v2900_v28 = vpop.xlane.xlu0 %2899 }
 0x847   : > { %v2910_v10 = vsub.f32 %v2666_v14, %v2900_v28 }
 0x849   : > { %v2914_v31 = vmul.f32 1.442695, %v2910_v10 }
 0x84a   : > { %v2903_v32 = vpop.xlane.xlu1 %2902  ;;  %v2906_v34 = vpop.xlane.xlu0 %2905 }
 0x84b   : > { %5588 = vpow2.f32 %v2914_v31  ;;  %v2911_v35 = vsub.f32 %v2742_v19, %v2903_v32  ;;  %v2912_v36 = vsub.f32 %v2818_v15, %v2906_v34 }
 0x84d   : > { %v2916_v40 = vmul.f32 1.442695, %v2911_v35  ;;  %v2918_v41 = vmul.f32 1.442695, %v2912_v36 }
 0x84e   : > { %v2909_v42 = vpop.xlane.xlu0 %2908 }
 0x84f   : > { %5590 = vpow2.f32 %v2916_v40  ;;  %v2913_v43 = vsub.f32 %v2894_v24, %v2909_v42 }
 0x850   : > { %5592 = vpow2.f32 %v2918_v41 }
 0x851   : > { %v2920_v44 = vmul.f32 1.442695, %v2913_v43 }
 0x853   : > { %5594 = vpow2.f32 %v2920_v44 }
 0x858   : > { %v6352_v45 = vpop.eup %5588 }
 0x859   : > { %v2922_v39 = vsel %vm982_vm2, %v6352_v45, 0.0 }
 0x85a   : > { %2923 = vadd.xlane.f32.xlu1 %v2922_v39 }
 0x85c   : > { %v6356_v48 = vpop.eup %5590 }
 0x85d   : > { %v6358_v49 = vpop.eup %5592  ;;  %v2925_v51 = vsel %vm982_vm2, %v6356_v48, 0.0 }
 0x85e   : > { %2926 = vadd.xlane.f32.xlu0 %v2925_v51  ;;  %v2928_v52 = vsel %vm982_vm2, %v6358_v49, 0.0 }
 0x85f   : > { %2929 = vadd.xlane.f32.xlu1 %v2928_v52 }
 0x860   : > { %v6364_v53 = vpop.eup %5594 }
 0x861   : > { %v2931_v54 = vsel %vm982_vm2, %v6364_v53, 0.0 }
 0x862   : > { %2932 = vadd.xlane.f32.xlu0 %v2931_v54 }
 0x870   : > { %2450 = vrot.lane.b32.xlu1 %v6250_v47, %s5808_s27  ;;  %v2447_v47 = vpop.permute.xlu1 %2446 }
 0x874   : > { %2452 = vrot.lane.b32.xlu1 %v6256_v50, %s5808_s27 }
 0x878   : > { %3684 = vrot.lane.b32.xlu1 %v6298_v11, %s5809_s22  ;;  %2448 = vrot.lane.b32.xlu0 %v6248_v46, %s5808_s27 }
 0x87c   : > { %3532 = vrot.lane.b32.xlu1 %v6290_v27, %s5808_s27  ;;  %3681 = vrot.lane.b32.xlu0 %v6298_v11, %s5807_s21  ;;  %s433_s21 = sand.u32 1, %s5788_s14  }
 0x87d   : > { %s434_s22 = scalar_lea.vmem [#allocation10], %s433_s21  ;;  %s4944_s25 = scalar_lea.sflag [#allocation4], %s433_s21 }
 0x87e   : > { %s4956_s26 = sshll.u32 %s434_s22, 4  ;;  %s4957_s26 = int_to_ptr.vmem [resolvable:$true] %s4956_s26 }
 0x87f   : > { %s5724_s30 = scalar_lea.vmem %s4957_s26, 16 }
 0x880   : > { %3536 = vrot.lane.b32.xlu1 %v6300_v9, %s5808_s27  ;;  %3687 = vrot.lane.b32.xlu0 %v6298_v11, %s5806_s20  ;;  %s6638_s20 = smov 64   ;;  %p5725_p9 = scmp.ne.s32.totalorder %s4957_s26, %s5724_s30 }
 0x882   : > { %p5726_p12 = pnand %p5725_p9, %p5908_p5 }
 0x884   : > { %3534 = vrot.lane.b32.xlu0 %v6302_v29, %s5808_s27  ;;  %p5727_p13 = pneg %p5726_p12 }
 0x888   : > { %3538 = vrot.lane.b32.xlu0 %v6308_v33, %s5808_s27 }
 0x8e3   : > { %v2924_v46 = vpop.xlane.xlu1 %2923 }
 0x8e4   : > { %5596 = vrcp.f32 %v2924_v46 }
 0x8e7   : > { %v2927_v50 = vpop.xlane.xlu0 %2926 }
 0x8e8   : > { %v2930_v55 = vpop.xlane.xlu1 %2929  ;;  %5598 = vrcp.f32 %v2927_v50 }
 0x8e9   : > { %5600 = vrcp.f32 %v2930_v55 }
 0x8eb   : > { %v2933_v27 = vpop.xlane.xlu0 %2932 }
 0x8ec   : > { %v2451_v56 = vpop.permute.xlu1 %2450  ;;  %5602 = vrcp.f32 %v2933_v27 }
 0x8ed   : > { %v2458_v57 = vcombine.low %v2447_v47, %v2451_v56  ;;  %v2459_v58 = vcombine.high %v2447_v47, %v2451_v56 }
 0x8ef   : > { %v2449_v59 = vpop.permute.xlu0 %2448  ;;  %v2466_v62 = vrot.slane %v2458_v57, %v6050_v23  ;;  %v2473_v29 = vrot.slane %v2459_v58, %v6050_v23 }
 0x8f0   : > { %v2453_v60 = vpop.permute.xlu1 %2452 }
 0x8f1   : > { %v2474_v9 = vcombine.low %v2449_v59, %v2453_v60  ;;  %v2475_v61 = vcombine.high %v2449_v59, %v2453_v60  ;;  %v5597_v22 = vpop.eup %5596 }
 0x8f2   : > { %v2938_v31 = vmul.f32 %v5597_v22, %v6352_v45 }
 0x8f3   : > { %v2482_v33 = vrot.slane %v2474_v9, %v6050_v23  ;;  %v2489_v63 = vrot.slane %v2475_v61, %v6050_v23  ;;  %v6426_v51 = vpop.permute.xlu0 %3681 }
 0x8f5   : > { %v2490_v1 = vcombine.low %v2466_v62, %v2482_v33  ;;  %v2491_v2 = vcombine.high %v2466_v62, %v2482_v33  ;;  %v2506_v3 = vcombine.low %v2473_v29, %v2489_v63  ;;  %v2507_v4 = vcombine.high %v2473_v29, %v2489_v63  ;;  %v5599_v24 = vpop.eup %5598 }
 0x8f6   : > { %v2939_v32 = vmul.f32 %v5599_v24, %v6356_v48  ;;  %v5601_v40 = vpop.eup %5600  ;;  %v2150_v48 = vld [vmem:[#allocation7 + $0x8] sm:$0xff] }
 0x8f7   : > { %v2498_v5 = vrot.slane %v2490_v1, %v6052_v30  ;;  %v2505_v6 = vrot.slane %v2491_v2, %v6052_v30  ;;  %v2514_v7 = vrot.slane %v2506_v3, %v6052_v30  ;;  %v2521_v8 = vrot.slane %v2507_v4, %v6052_v30  ;;  %v6428_v52 = vpop.permute.xlu0 %3687 }
 0x8f8   : > { %v2940_v45 = vmul.f32 %v5601_v40, %v6358_v49  ;;  %v2149_v49 = vld [vmem:[#allocation7] sm:$0xff]  ;;  %v3706_v46 = vcombine.low %v6426_v51, %v6428_v52  ;;  %v3707_v50 = vcombine.high %v6426_v51, %v6428_v52 }
 0x8f9   : > { %v2526_v12 = vcombine.low %v2498_v5, %v2505_v6  ;;  %v5121_v13 = vcombine.high %v2498_v5, %v2505_v6  ;;  %v2542_v14 = vcombine.low %v2514_v7, %v2521_v8  ;;  %v5122_v15 = vcombine.high %v2514_v7, %v2521_v8  ;;  %v5603_v42 = vpop.eup %5602 }
 0x8fa   : > { %v2941_v39 = vmul.f32 %v5603_v42, %v6364_v53  ;;  %v6430_v53 = vpop.permute.xlu1 %3684  ;;  %v3714_v60 = vrot.slane %v3706_v46, %v6050_v23  ;;  %v3721_v9 = vrot.slane %v3707_v50, %v6050_v23  ;;  %v2152_v42 = vld [vmem:[#allocation7 + $0x18] sm:$0xff] }
 0x8fb   : > { %v2533_v16 = vrot.slane %v2526_v12, %v6050_v23  ;;  %v2541_v17 = vrot.slane %v5121_v13, %v6050_v23  ;;  %v2549_v18 = vrot.slane %v2542_v14, %v6050_v23  ;;  %v2557_v19 = vrot.slane %v5122_v15, %v6050_v23  ;;  %v3535_v54 = vpop.permute.xlu0 %3534 }
 0x8fc   : > { %v3690_v27 = vcombine.low %v6298_v11, %v6430_v53  ;;  %v3691_v56 = vcombine.high %v6298_v11, %v6430_v53 }
 0x8fd   : > { %v2558_v20 = vcombine.low %v2533_v16, %v2541_v17  ;;  %v2574_v21 = vcombine.low %v2549_v18, %v2557_v19  ;;  %v2559_v34 = vcombine.high %v2533_v16, %v2541_v17  ;;  %v2575_v36 = vcombine.high %v2549_v18, %v2557_v19 }
 0x8fe   : > { %v3533_v47 = vpop.permute.xlu1 %3532  ;;  %v3698_v29 = vrot.slane %v3690_v27, %v6050_v23  ;;  %v3705_v33 = vrot.slane %v3691_v56, %v6050_v23 }
 0x8ff   : > { %v2566_v25 = vrot.slane %v2558_v20, %v6052_v30  ;;  %v2582_v26 = vrot.slane %v2574_v21, %v6052_v30  ;;  %v2573_v35 = vrot.slane %v2559_v34, %v6052_v30  ;;  %v2589_v41 = vrot.slane %v2575_v36, %v6052_v30  ;;  %v3539_v55 = vpop.permute.xlu0 %3538 }
 0x900   : > { %v3560_v58 = vcombine.low %v3535_v54, %v3539_v55  ;;  %v3561_v59 = vcombine.high %v3535_v54, %v3539_v55  ;;  %v3722_v2 = vcombine.low %v3698_v29, %v3714_v60  ;;  %v3723_v3 = vcombine.high %v3698_v29, %v3714_v60 }
 0x901   : > { %v2590_v28 = vcombine.low %v2566_v25, %v2582_v26  ;;  %v2591_v10 = vcombine.high %v2566_v25, %v2582_v26  ;;  %v2592_v43 = vcombine.low %v2573_v35, %v2589_v41  ;;  %v2593_v44 = vcombine.high %v2573_v35, %v2589_v41 }
 0x902   : > { %v3537_v57 = vpop.permute.xlu1 %3536  ;;  %v3568_v63 = vrot.slane %v3560_v58, %v6050_v23  ;;  %v3575_v1 = vrot.slane %v3561_v59, %v6050_v23  ;;  %v3738_v4 = vcombine.low %v3705_v33, %v3721_v9  ;;  %v3739_v5 = vcombine.high %v3705_v33, %v3721_v9 }
 0x903   : > { %5381 = vmatpush3.msra.mxu0 %v2590_v28  ;;  %5386 = vmatpush3.msra.mxu1 %v2591_v10  ;;  %v3544_v61 = vcombine.low %v3533_v47, %v3537_v57  ;;  %v3545_v62 = vcombine.high %v3533_v47, %v3537_v57  ;;  %v3730_v15 = vrot.slane %v3722_v2, %v6052_v30 }
 0x904   : > { %5383 = vmatmul.mubr.msk.f32.vlgmr.msra.gmra.mxu0 %vm982_vm2, %v2938_v31  ;;  %5388 = vmatmul.mubr.msk.f32.vlgmr.msra.gmra.mxu1 %vm982_vm2, %v2939_v32  ;;  %v3737_v16 = vrot.slane %v3723_v3, %v6052_v30  ;;  %v3746_v17 = vrot.slane %v3738_v4, %v6052_v30  ;;  %v3753_v18 = vrot.slane %v3739_v5, %v6052_v30 }
 0x905   : > { %5390 = vmatprep.subr.mxu0 %v5804_v0  ;;  %5395 = vmatprep.subr.mxu1 %v5804_v0  ;;  %v3552_v6 = vrot.slane %v3544_v61, %v6050_v23  ;;  %v3559_v7 = vrot.slane %v3545_v62, %v6050_v23 }
 0x906   : > { %5392 = vmatprep.mubr.msk.f32.mxu0 %vm5805_vm0, %v5804_v0  ;;  %5397 = vmatprep.mubr.msk.f32.mxu1 %vm5805_vm0, %v5804_v0  ;;  %v3758_v24 = vcombine.low %v3730_v15, %v3737_v16  ;;  %v5141_v25 = vcombine.high %v3730_v15, %v3737_v16  ;;  %v3774_v26 = vcombine.low %v3746_v17, %v3753_v18 }
 0x907   : > { %5391 = vmatpush3.msra.mxu0 %v2592_v43  ;;  %5396 = vmatpush3.msra.mxu1 %v2593_v44  ;;  %v3576_v8 = vcombine.low %v3552_v6, %v3568_v63  ;;  %v3577_v12 = vcombine.high %v3552_v6, %v3568_v63  ;;  %v3592_v13 = vcombine.low %v3559_v7, %v3575_v1 }
 0x908   : > { %5393 = vmatmul.mubr.msk.f32.vlgmr.msra.gmra.mxu0 %vm982_vm2, %v2940_v45  ;;  %5398 = vmatmul.mubr.msk.f32.vlgmr.msra.gmra.mxu1 %vm982_vm2, %v2941_v39  ;;  %v3593_v14 = vcombine.high %v3559_v7, %v3575_v1  ;;  %v5142_v28 = vcombine.high %v3746_v17, %v3753_v18  ;;  %v3765_v35 = vrot.slane %v3758_v24, %v6050_v23 }
 0x909   : > { %5400 = vmatprep.subr.mxu0 %v5804_v0  ;;  %5405 = vmatprep.subr.mxu1 %v5804_v0  ;;  %v3584_v19 = vrot.slane %v3576_v8, %v6052_v30  ;;  %v3591_v20 = vrot.slane %v3577_v12, %v6052_v30  ;;  %v3600_v21 = vrot.slane %v3592_v13, %v6052_v30 }
 0x90a   : > { %5402 = vmatprep.mubr.msk.f32.mxu0 %vm5805_vm0, %v5804_v0  ;;  %5407 = vmatprep.mubr.msk.f32.mxu1 %vm5805_vm0, %v5804_v0  ;;  %v3607_v22 = vrot.slane %v3593_v14, %v6052_v30  ;;  %v3773_v36 = vrot.slane %v5141_v25, %v6050_v23  ;;  %v3781_v40 = vrot.slane %v3774_v26, %v6050_v23 }
 0x90b   : > { %5401 = vmatpush3.msra.mxu0 %v2150_v48  ;;  %5406 = vmatpush3.msra.mxu1 %v2149_v49  ;;  %v3612_v10 = vcombine.low %v3584_v19, %v3591_v20  ;;  %v5139_v31 = vcombine.high %v3584_v19, %v3591_v20  ;;  %v3789_v41 = vrot.slane %v5142_v28, %v6050_v23  ;;  %v2151_v49 = vld [vmem:[#allocation7 + $0x10] sm:$0xff] }
 0x90c   : > { %5410 = vmatprep.subr.mxu0 %v5804_v0  ;;  %5415 = vmatprep.subr.mxu1 %v5804_v0  ;;  %v3628_v32 = vcombine.low %v3600_v21, %v3607_v22  ;;  %v5140_v34 = vcombine.high %v3600_v21, %v3607_v22  ;;  %v3790_v54 = vcombine.low %v3765_v35, %v3773_v36 }
 0x90d   : > { %v3619_v43 = vrot.slane %v3612_v10, %v6050_v23  ;;  %v3627_v44 = vrot.slane %v5139_v31, %v6050_v23  ;;  %v3806_v47 = vcombine.low %v3781_v40, %v3789_v41  ;;  %v3791_v57 = vcombine.high %v3765_v35, %v3773_v36 }
 0x90e   : > { %v3635_v45 = vrot.slane %v3628_v32, %v6050_v23  ;;  %v3643_v39 = vrot.slane %v5140_v34, %v6050_v23  ;;  %v3807_v58 = vcombine.high %v3781_v40, %v3789_v41  ;;  %v3798_v59 = vrot.slane %v3790_v54, %v6052_v30 }
 0x90f   : > { %v3644_v27 = vcombine.low %v3619_v43, %v3627_v44  ;;  %v3814_v60 = vrot.slane %v3806_v47, %v6052_v30  ;;  %v3645_v9 = vcombine.high %v3619_v43, %v3627_v44  ;;  %v3805_v1 = vrot.slane %v3791_v57, %v6052_v30 }
 0x910   : > { %v3660_v56 = vcombine.low %v3635_v45, %v3643_v39  ;;  %v3661_v61 = vcombine.high %v3635_v45, %v3643_v39  ;;  %v3821_v2 = vrot.slane %v3807_v58, %v6052_v30 }
 0x911   : > { %v3652_v62 = vrot.slane %v3644_v27, %v6052_v30  ;;  %v3822_v63 = vcombine.low %v3798_v59, %v3814_v60  ;;  %v3823_v4 = vcombine.high %v3798_v59, %v3814_v60  ;;  %v3659_v8 = vrot.slane %v3645_v9, %v6052_v30 }
 0x912   : > { %v3668_v29 = vrot.slane %v3660_v56, %v6052_v30  ;;  %v3675_v12 = vrot.slane %v3661_v61, %v6052_v30  ;;  %v3824_v14 = vcombine.low %v3805_v1, %v3821_v2  ;;  %v3825_v15 = vcombine.high %v3805_v1, %v3821_v2 }
 0x914   : > { %v3676_v7 = vcombine.low %v3652_v62, %v3668_v29  ;;  %v3677_v13 = vcombine.high %v3652_v62, %v3668_v29  ;;  %v3678_v16 = vcombine.low %v3659_v8, %v3675_v12  ;;  %v3679_v17 = vcombine.high %v3659_v8, %v3675_v12 }
 0x9c4   : > { %v3011_v48 = vpop.f32.mrf.mxu0  ;;  %v3084_v46 = vpop.f32.mrf.mxu1 }
 0x9c5   : > { %5408 = vmatmul.mubr.msk.f32.vlgmr.msra.gmra.mxu1 %vm982_vm2, %v3011_v48  ;;  %5403 = vmatmul.mubr.msk.f32.vlgmr.msra.gmra.mxu0 %vm982_vm2, %v3084_v46 }
 0x9c6   : > { %v5384_v50 = vpop.f32.mrf.mxu0  ;;  %5416 = vmatpush3.msra.mxu1 %v2152_v42  ;;  %v5389_v55 = vpop.f32.mrf.mxu1  ;;  %5411 = vmatpush3.msra.mxu0 %v2151_v49 }
 0x9c7   : > { %5412 = vmatprep.mubr.msk.f32.mxu0 %vm5805_vm0, %v5804_v0  ;;  %5417 = vmatprep.mubr.msk.f32.mxu1 %vm5805_vm0, %v5804_v0 }
 0x9c8   : > { %5420 = vmatprep.subr.mxu0 %v5804_v0  ;;  %5425 = vmatprep.subr.mxu1 %v5804_v0  ;;  %v3157_v33 = vpop.f32.mrf.mxu0  ;;  %v3230_v3 = vpop.f32.mrf.mxu1 }
 0x9c9   : > { %5413 = vmatmul.mubr.msk.f32.vlgmr.msra.gmra.mxu0 %vm982_vm2, %v3157_v33  ;;  %5418 = vmatmul.mubr.msk.f32.vlgmr.msra.gmra.mxu1 %vm982_vm2, %v3230_v3 }
 0x9ca   : > { %5421 = vmatpush3.xpose.msk.msra.mxu0 %vm982_vm2, %v3822_v63  ;;  %v5394_v5 = vpop.f32.mrf.mxu0  ;;  %5426 = vmatpush3.xpose.msk.msra.mxu1 %vm982_vm2, %v3823_v4  ;;  %v5399_v6 = vpop.f32.mrf.mxu1 }
 0x9cb   : > { %5422 = vmatprep.mubr.msk.f32.mxu0 %vm5805_vm0, %v5804_v0  ;;  %5427 = vmatprep.mubr.msk.f32.mxu1 %vm5805_vm0, %v5804_v0 }
 0x9cc   : > { %5430 = vmatprep.subr.mxu0 %v5804_v0  ;;  %5435 = vmatprep.subr.mxu1 %v5804_v0 }
 0x9cd   : > { %5423 = vmatmul.mubr.msk.f32.vlgmr.msra.gmra.mxu0 %vm982_vm2, %v3676_v7  ;;  %5428 = vmatmul.mubr.msk.f32.vlgmr.msra.gmra.mxu1 %vm982_vm2, %v3677_v13 }
 0x9ce   : > { %5431 = vmatpush3.xpose.msk.msra.mxu0 %vm982_vm2, %v3824_v14  ;;  %5436 = vmatpush3.xpose.msk.msra.mxu1 %vm982_vm2, %v3825_v15 }
 0x9cf   : > { %5432 = vmatprep.mubr.msk.f32.mxu0 %vm5805_vm0, %v5804_v0  ;;  %5437 = vmatprep.mubr.msk.f32.mxu1 %vm5805_vm0, %v5804_v0 }
 0x9d0   : > { %5440 = vmatprep.subr.mxu0 %v5804_v0  ;;  %5445 = vmatprep.subr.mxu1 %v5804_v0 }
 0x9d1   : > { %5433 = vmatmul.mubr.msk.f32.vlgmr.msra.gmra.mxu0 %vm982_vm2, %v3678_v16  ;;  %5438 = vmatmul.mubr.msk.f32.vlgmr.msra.gmra.mxu1 %vm982_vm2, %v3679_v17 }
 0x9d2   : > { %5442 = vmatprep.mubr.msk.f32.mxu0 %vm5805_vm0, %v5804_v0  ;;  %5447 = vmatprep.mubr.msk.f32.mxu1 %vm5805_vm0, %v5804_v0 }
 0xa85   : > { %v3376_v18 = vpop.f32.mrf.mxu1  ;;  %v3303_v19 = vpop.f32.mrf.mxu0 }
 0xa86   : > { %v3377_v20 = vadd.f32 %v3376_v18, %v3303_v19 }
 0xa87   : > { %v5409_v21 = vpop.f32.mrf.mxu1  ;;  %v5404_v22 = vpop.f32.mrf.mxu0 }
 0xa89   : > { %v3449_v24 = vpop.f32.mrf.mxu0  ;;  %v3523_v26 = vpop.f32.mrf.mxu1 }
 0xa8a   : > { %v3453_v25 = vadd.f32 %v3449_v24, %v3377_v20 }
 0xa8b   : > { %v5414_v28 = vpop.f32.mrf.mxu0  ;;  %v5419_v31 = vpop.f32.mrf.mxu1 }
 0xa8c   : > { %v3527_v10 = vadd.f32 %v3523_v26, %v3453_v25 }
 0xa8d   : > { %v4046_v32 = vpop.f32.mrf.mxu0  ;;  %v4122_v34 = vpop.f32.mrf.mxu1 }
 0xa8e   : > { %v4278_v35 = vsel %vm982_vm2, %v4046_v32, -inf  ;;  %v4281_v36 = vsel %vm982_vm2, %v4122_v34, -inf  ;;  %v4915_v62 = vsel %vm454_vm1, %v3527_v10, 0.0 }
 0xa8f   : > { %4279 = vmax.xlane.f32.xlu1 %v4278_v35  ;;  %v5424_v40 = vpop.f32.mrf.mxu0  ;;  %4282 = vmax.xlane.f32.xlu0 %v4281_v36  ;;  %v5429_v41 = vpop.f32.mrf.mxu1  ;;  %v4916_v63 = vrot.slane %v4915_v62, 4 }
 0xa91   : > { %v4198_v42 = vpop.f32.mrf.mxu0  ;;  %v4274_v43 = vpop.f32.mrf.mxu1  ;;  %v4917_v3 = vadd.f32 %v4916_v63, %v4915_v62 }
 0xa92   : > { %v4284_v44 = vsel %vm982_vm2, %v4198_v42, -inf  ;;  %v4287_v45 = vsel %vm982_vm2, %v4274_v43, -inf }
 0xa93   : > { %v5434_v39 = vpop.f32.mrf.mxu0  ;;  %v5439_v48 = vpop.f32.mrf.mxu1  ;;  %4288 = vmax.xlane.f32.xlu1 %v4287_v45  ;;  %4285 = vmax.xlane.f32.xlu0 %v4284_v44  ;;  %v4918_v4 = vrot.slane %v4917_v3, 2 }
 0xa95   : > { %v4919_v5 = vadd.f32 %v4918_v4, %v4917_v3  ;;  %v3531_v4 = vld [vmem:[#allocation8 + $0x18] sm:$0xff] }
 0xa97   : > { %v4920_v6 = vrot.slane %v4919_v5, 1 }
 0xa99   : > { %v4921_v7 = vadd.f32 %v4920_v6, %v4919_v5 }
 0xaa4   : > { %3828 = vrot.lane.b32.xlu1 %v6426_v51, %s5808_s27 }
 0xaa9   : > { %3826 = vrot.lane.b32.xlu0 %v6298_v11, %s5808_s27 }
 0xb18   : > { %v4280_v49 = vpop.xlane.xlu1 %4279  ;;  %v4283_v54 = vpop.xlane.xlu0 %4282 }
 0xb19   : > { %v4290_v47 = vsub.f32 %v4046_v32, %v4280_v49  ;;  %v4291_v46 = vsub.f32 %v4122_v34, %v4283_v54 }
 0xb1b   : > { %v4294_v50 = vmul.f32 1.442695, %v4290_v47  ;;  %v4296_v55 = vmul.f32 1.442695, %v4291_v46 }
 0xb1c   : > { %v4289_v27 = vpop.xlane.xlu1 %4288  ;;  %v4286_v56 = vpop.xlane.xlu0 %4285 }
 0xb1d   : > { %5604 = vpow2.f32 %v4294_v50  ;;  %v4293_v57 = vsub.f32 %v4274_v43, %v4289_v27  ;;  %v4292_v58 = vsub.f32 %v4198_v42, %v4286_v56 }
 0xb1e   : > { %5606 = vpow2.f32 %v4296_v55 }
 0xb1f   : > { %v4300_v59 = vmul.f32 1.442695, %v4293_v57  ;;  %v4298_v60 = vmul.f32 1.442695, %v4292_v58 }
 0xb20   : > { %v3827_v8 = vpop.permute.xlu0 %3826  ;;  %v3829_v12 = vpop.permute.xlu1 %3828 }
 0xb21   : > { %5608 = vpow2.f32 %v4300_v59 }
 0xb22   : > { %5610 = vpow2.f32 %v4298_v60 }
 0xb2a   : > { %v6514_v51 = vpop.eup %5604 }
 0xb2b   : > { %v6516_v9 = vpop.eup %5606  ;;  %v4302_v11 = vsel %vm982_vm2, %v6514_v51, 0.0 }
 0xb2c   : > { %v4305_v61 = vsel %vm982_vm2, %v6516_v9, 0.0  ;;  %4303 = vadd.xlane.f32.xlu0 %v4302_v11 }
 0xb2d   : > { %4306 = vadd.xlane.f32.xlu1 %v4305_v61 }
 0xb2e   : > { %v6523_v29 = vpop.eup %5608 }
 0xb2f   : > { %v6525_v33 = vpop.eup %5610  ;;  %v4311_v1 = vsel %vm982_vm2, %v6523_v29, 0.0 }
 0xb30   : > { %v4308_v2 = vsel %vm982_vm2, %v6525_v33, 0.0 }
 0xb31   : > { %4312 = vadd.xlane.f32.xlu1 %v4311_v1  ;;  %4309 = vadd.xlane.f32.xlu0 %v4308_v2 }
 0xb42   : > { %3830 = vrot.lane.b32.xlu1 %v6430_v53, %s5808_s27 }
 0xb46   : > { %4930 = vrot.lane.b32.xlu1 %v4921_v7, %s5813_s28 }
 0xb47   : > { %3832 = vrot.lane.b32.xlu0 %v6428_v52, %s5808_s27  ;;  %s5161_s27 = sshll.u32 %s5891_s17, 4  ;;  %s5814_s17 = smov [#allocation10]  }
 0xb48   : > { %s4954_s18 = scalar_lea.hbm %s6631_s10, %s5161_s27  ;;  %s5728_s29 = sshll.u32 %s5814_s17, 4  ;;  %s5729_s29 = int_to_ptr.vmem [resolvable:$false] %s5728_s29 }
 0xb49   : > { %s5730_s28 = scalar_lea.vmem %s5729_s29, 32  ;;  %p5731_p4 = scmp.lt.s32.totalorder %s4957_s26, %s5729_s29 }
 0xb4a   : > { %p5732_p7 = scmp.lt.s32.totalorder %s5730_s28, %s5724_s30 }
 0xb4c   : > { %p5733_p8 = por %p5732_p7, %p5731_p4 }
 0xb4e   : > { %p5734_p11 = pnand %p5733_p8, %p5727_p13 }
 0xbb5   : > { %v4304_v13 = vpop.xlane.xlu0 %4303 }
 0xbb6   : > { %v4307_v14 = vpop.xlane.xlu1 %4306  ;;  %5612 = vrcp.f32 %v4304_v13 }
 0xbb7   : > { %5614 = vrcp.f32 %v4307_v14 }
 0xbba   : > { %v4313_v15 = vpop.xlane.xlu1 %4312  ;;  %v4310_v16 = vpop.xlane.xlu0 %4309 }
 0xbbb   : > { %5616 = vrcp.f32 %v4313_v15 }
 0xbbc   : > { %5618 = vrcp.f32 %v4310_v16 }
 0xbbe   : > { %v3831_v17 = vpop.permute.xlu1 %3830  ;;  %v3833_v20 = vpop.permute.xlu0 %3832 }
 0xbbf   : > { %v3838_v18 = vcombine.low %v3827_v8, %v3831_v17  ;;  %v3839_v19 = vcombine.high %v3827_v8, %v3831_v17  ;;  %v3854_v21 = vcombine.low %v3829_v12, %v3833_v20  ;;  %v3855_v22 = vcombine.high %v3829_v12, %v3833_v20 }
 0xbc1   : > { %v3846_v53 = vrot.slane %v3838_v18, %v6050_v23  ;;  %v3853_v24 = vrot.slane %v3839_v19, %v6050_v23  ;;  %v3862_v52 = vrot.slane %v3854_v21, %v6050_v23  ;;  %v3869_v25 = vrot.slane %v3855_v22, %v6050_v23 }
 0xbc3   : > { %v3870_v26 = vcombine.low %v3846_v53, %v3862_v52  ;;  %v3871_v28 = vcombine.high %v3846_v53, %v3862_v52  ;;  %v3886_v10 = vcombine.low %v3853_v24, %v3869_v25  ;;  %v3887_v31 = vcombine.high %v3853_v24, %v3869_v25  ;;  %v5613_v50 = vpop.eup %5612 }
 0xbc4   : > { %v5615_v55 = vpop.eup %5614  ;;  %v4318_v61 = vmul.f32 %v5613_v50, %v6514_v51 }
 0xbc5   : > { %v3878_v32 = vrot.slane %v3870_v26, %v6052_v30  ;;  %v3885_v34 = vrot.slane %v3871_v28, %v6052_v30  ;;  %v3894_v35 = vrot.slane %v3886_v10, %v6052_v30  ;;  %v3901_v36 = vrot.slane %v3887_v31, %v6052_v30 }
 0xbc7   : > { %v3906_v40 = vcombine.low %v3878_v32, %v3885_v34  ;;  %v5143_v41 = vcombine.high %v3878_v32, %v3885_v34  ;;  %v3922_v42 = vcombine.low %v3894_v35, %v3901_v36  ;;  %v5144_v43 = vcombine.high %v3894_v35, %v3901_v36 }
 0xbc8   : > { %v5617_v59 = vpop.eup %5616  ;;  %v4908_v32 = vsel %vm454_vm1, %v1917_v38, 0.0 }
 0xbc9   : > { %v3913_v44 = vrot.slane %v3906_v40, %v6050_v23  ;;  %v3921_v45 = vrot.slane %v5143_v41, %v6050_v23  ;;  %v3929_v39 = vrot.slane %v3922_v42, %v6050_v23  ;;  %v3937_v48 = vrot.slane %v5144_v43, %v6050_v23  ;;  %v5619_v62 = vpop.eup %5618  ;;  %v4931_v42 = vpop.permute.xlu1 %4930 }
 0xbca   : > { %v4319_v23 = vmul.f32 %v5615_v55, %v6516_v9  ;;  %v4321_v51 = vmul.f32 %v5617_v59, %v6523_v29  ;;  %v3529_v9 = vld [vmem:[#allocation8 + $0x8] sm:$0xff]  ;;  %v3528_v29 = vld [vmem:[#allocation8] sm:$0xff]  ;;  %v4909_v34 = vrot.slane %v4908_v32, 4 }
 0xbcb   : > { %v3938_v49 = vcombine.low %v3913_v44, %v3921_v45  ;;  %v3954_v54 = vcombine.low %v3929_v39, %v3937_v48  ;;  %v3939_v47 = vcombine.high %v3913_v44, %v3921_v45  ;;  %v3955_v46 = vcombine.high %v3929_v39, %v3937_v48 }
 0xbcc   : > { %v4910_v35 = vadd.f32 %v4909_v34, %v4908_v32 }
 0xbcd   : > { %v3946_v27 = vrot.slane %v3938_v49, %v6052_v30  ;;  %v3962_v56 = vrot.slane %v3954_v54, %v6052_v30  ;;  %v3953_v57 = vrot.slane %v3939_v47, %v6052_v30  ;;  %v3969_v58 = vrot.slane %v3955_v46, %v6052_v30 }
 0xbce   : > { %v4320_v30 = vmul.f32 %v5619_v62, %v6525_v33  ;;  %v3530_v33 = vld [vmem:[#allocation8 + $0x10] sm:$0xff]  ;;  %v4911_v36 = vrot.slane %v4910_v35, 2 }
 0xbcf   : > { %v3970_v60 = vcombine.low %v3946_v27, %v3962_v56  ;;  %v3971_v11 = vcombine.high %v3946_v27, %v3962_v56  ;;  %v3972_v63 = vcombine.low %v3953_v57, %v3969_v58  ;;  %v3973_v1 = vcombine.high %v3953_v57, %v3969_v58 }
 0xbd0   : > { %v4912_v40 = vadd.f32 %v4911_v36, %v4910_v35 }
 0xbd1   : > { %5441 = vmatpush3.msra.mxu0 %v3970_v60  ;;  %5446 = vmatpush3.msra.mxu1 %v3971_v11 }
 0xbd2   : > { %5443 = vmatmul.mubr.msk.f32.vlgmr.msra.gmra.mxu0 %vm982_vm2, %v4318_v61  ;;  %5448 = vmatmul.mubr.msk.f32.vlgmr.msra.gmra.mxu1 %vm982_vm2, %v4319_v23  ;;  %v4913_v41 = vrot.slane %v4912_v40, 1 }
 0xbd3   : > { %5450 = vmatprep.subr.mxu0 %v5804_v0  ;;  %5455 = vmatprep.subr.mxu1 %v5804_v0 }
 0xbd4   : > { %5451 = vmatpush3.msra.mxu0 %v3972_v63  ;;  %5456 = vmatpush3.msra.mxu1 %v3973_v1  ;;  %v4914_v43 = vadd.f32 %v4913_v41, %v4912_v40 }
 0xbd5   : > { %5452 = vmatprep.mubr.msk.f32.mxu0 %vm5805_vm0, %v5804_v0  ;;  %5457 = vmatprep.mubr.msk.f32.mxu1 %vm5805_vm0, %v5804_v0 }
 0xbd6   : > { %5453 = vmatmul.mubr.msk.f32.vlgmr.msra.gmra.mxu0 %vm982_vm2, %v4320_v30  ;;  %5458 = vmatmul.mubr.msk.f32.vlgmr.msra.gmra.mxu1 %vm982_vm2, %v4321_v51  ;;  %v4937_v44 = vsel %vm454_vm1, %v4914_v43, %v4931_v42 }
 0xbd7   : > { %5460 = vmatprep.subr.mxu0 %v5804_v0  ;;  %5465 = vmatprep.subr.mxu1 %v5804_v0 }
 0xbd8   : > { %5462 = vmatprep.mubr.msk.f32.mxu0 %vm5805_vm0, %v5804_v0  ;;  %5467 = vmatprep.mubr.msk.f32.mxu1 %vm5805_vm0, %v5804_v0 }
 0xbd9   : > { %5461 = vmatpush3.msra.mxu0 %v3529_v9  ;;  %5466 = vmatpush3.msra.mxu1 %v3528_v29 }
 0xbda   : > { %5470 = vmatprep.subr.mxu0 %v5804_v0  ;;  %5475 = vmatprep.subr.mxu1 %v5804_v0 }
 0xc92   : > { %v4391_v2 = vpop.f32.mrf.mxu0  ;;  %v4464_v3 = vpop.f32.mrf.mxu1 }
 0xc93   : > { %5463 = vmatmul.mubr.msk.f32.vlgmr.msra.gmra.mxu0 %vm982_vm2, %v4464_v3  ;;  %5468 = vmatmul.mubr.msk.f32.vlgmr.msra.gmra.mxu1 %vm982_vm2, %v4391_v2 }
 0xc94   : > { %v5444_v5 = vpop.f32.mrf.mxu0  ;;  %v5449_v6 = vpop.f32.mrf.mxu1  ;;  %5471 = vmatpush3.msra.mxu0 %v3530_v33  ;;  %5472 = vmatprep.mubr.msk.f32.mxu0 %vm5805_vm0, %v5804_v0 }
 0xc95   : > { %5476 = vmatpush3.msra.mxu1 %v3531_v4  ;;  %5477 = vmatprep.mubr.msk.f32.mxu1 %vm5805_vm0, %v5804_v0 }
 0xc96   : > { %v4537_v7 = vpop.f32.mrf.mxu0  ;;  %v4610_v8 = vpop.f32.mrf.mxu1 }
 0xc97   : > { %5473 = vmatmul.mubr.msk.f32.vlgmr.msra.gmra.mxu0 %vm982_vm2, %v4537_v7  ;;  %5478 = vmatmul.mubr.msk.f32.vlgmr.msra.gmra.mxu1 %vm982_vm2, %v4610_v8 }
 0xc98   : > { %v5454_v12 = vpop.f32.mrf.mxu0  ;;  %v5459_v13 = vpop.f32.mrf.mxu1 }
 0xd53   : > { %v4683_v14 = vpop.f32.mrf.mxu0  ;;  %v4756_v15 = vpop.f32.mrf.mxu1 }
 0xd54   : > { %v4757_v18 = vadd.f32 %v4756_v15, %v4683_v14 }
 0xd55   : > { %v5464_v16 = vpop.f32.mrf.mxu0  ;;  %v5469_v17 = vpop.f32.mrf.mxu1 }
 0xd57   : > { %v4829_v19 = vpop.f32.mrf.mxu0  ;;  %v4903_v20 = vpop.f32.mrf.mxu1 }
 0xd58   : > { %v4833_v21 = vadd.f32 %v4829_v19, %v4757_v18 }
 0xd59   : > { %v5474_v22 = vpop.f32.mrf.mxu0  ;;  %v5479_v53 = vpop.f32.mrf.mxu1 }
 0xd5a   : > { %v4907_v0 = vadd.f32 %v4903_v20, %v4833_v21 }
 0xd5c   : > { %v4922_v24 = vsel %vm454_vm1, %v4907_v0, 0.0 }
 0xd5d   : > { %v4923_v52 = vrot.slane %v4922_v24, 4 }
 0xd5f   : > { %v4924_v25 = vadd.f32 %v4923_v52, %v4922_v24 }
 0xd61   : > { %v4925_v26 = vrot.slane %v4924_v25, 2 }
 0xd63   : > { %v4926_v28 = vadd.f32 %v4925_v26, %v4924_v25 }
 0xd65   : > { %v4927_v10 = vrot.slane %v4926_v28, 1 }
 0xd67   : > { %v4928_v31 = vadd.f32 %v4927_v10, %v4926_v28 }
 0xd69   : > { %4934 = vrot.lane.b32.xlu0 %v4928_v31, %s6638_s20 }
 0xddb   : > { %v4935_v45 = vpop.permute.xlu0 %4934 }
 0xddc   : > { %v4939_v39 = vsel %vm4938_vm3, %v4937_v44, %v4935_v45 }
 0xddd   : > { %v4940_v37 = vmax.f32 %v4939_v39, 0.0 }
 0xddf   : > { %4942 = vst.msk [vmem:[%s434_s22] sm:$0x1] %vm4941_vm4, %v4940_v37 }
 0xde0   : > { %5737 = shalt.err (!%p5734_p11)
}
 0xde1   : > { %s5738_s20 = scalar_lea.hbm %s4954_s18, 16  ;;  %s5742_s22 = scalar_lea.hbm %s6631_s10, 32 }
 0xde2   : > { %p5739_p0 = scmp.ne.s32.totalorder %s4954_s18, %s5738_s20  ;;  %p5743_p3 = scmp.lt.s32.totalorder %s4954_s18, %s6631_s10 }
 0xde3   : > { %p5744_p10 = scmp.lt.s32.totalorder %s5742_s22, %s5738_s20 }
 0xde4   : > { %p5740_p2 = pnand %p5739_p0, %p5908_p5 }
 0xde5   : > { %p5745_p9 = por %p5744_p10, %p5743_p3 }
 0xde6   : > { %p5741_p1 = pneg %p5740_p2 }
 0xde8   : > { %p5746_p12 = pnand %p5745_p9, %p5741_p1 }
 0xdea   : > { %5749 = shalt.err (!%p5746_p12)
}
 0xdeb   : > { %5496 = dma.vmem_to_hbm [thread:$0]  (%p5908_p5), %s4957_s26, 16, %s4954_s18, %s4944_s25  }
 0xdec PF: > { %p5523_p13 = scmp.ge.s32.totalorder %s5796_s16, 2  ;;  %s4968_s30 = sand.u32 1, %s5784_s13  }
 0xded   : > { %s4969_s17 = scalar_lea.sflag [#allocation4], %s4968_s30 }
 0xdee   : > { %p5512_p4 = pnand %p5523_p13, %p5912_p6 }
 0xdf0   : > { %p5513_p7 = pneg %p5512_p4 }
 0xdf2   : > { %5779 = dma.done.wait (%p5513_p7), %s4969_s17, 16  }
 0xdf3   : > { %5781 = vsyncadd (%p5513_p7), %s4969_s17, 4294967280  ;;  %s6639_s29 = sld [smem:[#allocation15_spill]]  ;;  %p23_p8 = scmp.ge.s32.totalorder %s5895_s19, 4  }
 0xdf4   : > { %s6640_s13 = smov %s5788_s14  ;;  %s6641_s14 = smov %s5792_s15 }
 0xdf5   : > { %s6643_s16 = smov %s5895_s19  ;;  %25 = sbr.rel (!%p23_p8) target bundleno = 6 (0x6), region = 118 }
 0xdf9   : > { %s6642_s15 = smov %s6639_s29 }
 0xdfa   :  { %4973 = vsyncpa [#allocation3], 1 }
 0xdfb   :  { %4975 = vsyncpa [#allocation3 + $0x1], 1 }
 0xdfc   :  { %4976 = vsyncpa [#allocation6], 1 }
 0xdfd   :  { %4977 = vsyncpa [#allocation9], 1 }
 0xdfe   :  { %4978 = vsyncpa [#allocation4], 1 }
 0xdff   :  { %4980 = vsyncpa [#allocation4 + $0x1], 1 }

</bundles_post_ra>
